<compile_context>
chip_gen: v7x
topology: tpu7x:2x2x1
jax: 0.10.0
libtpu: 0.0.40
codegen_flags: <defaults>
</compile_context>

<pallas_src>
import functools

import jax
import jax.numpy as jnp
from jax import lax
from jax.experimental import pallas as pl
from jax.experimental.pallas import tpu as pltpu


def _round_up(x, m):
    return ((x + m - 1) // m) * m


def _vmem_capacity_bytes():
    """Physical per-core VMEM (v5e/v6e: 128 MiB, v7x: 64 MiB per TC)."""
    try:
        cap = getattr(pltpu.get_tpu_info(), "vmem_capacity_bytes", None)
        if cap:
            return int(cap)
    except Exception:
        pass
    return 64 << 20  # conservative default (v7x per-TensorCore VMEM)


def _vmem_limit(working_set_bytes, capacity_bytes):
    limit = int(1.25 * working_set_bytes) + (4 << 20)
    limit = max(limit, 16 << 20)
    return min(limit, capacity_bytes)


def _choose_tile_t(T, batch):
    """Time tile: 512 (multiple of 256 -> full 2x256 MXU passes, amortizes
    ~0.35us/grid-step) for long sequences; short sequences use one
    sublane-aligned tile.  For batch==1, split so the parallel grid has >= 2
    steps and v7x's two TensorCores both get work."""
    tile = 512 if T >= 512 else _round_up(max(T, 8), 8)
    if batch == 1 and T > 8 and pl.cdiv(T, tile) < 2:
        tile = _round_up(pl.cdiv(T, 2), 8)
    return tile


# --------------------------------------------------------------------------
# Kernels
# --------------------------------------------------------------------------
def _resident_kernel(codes_ref, ftab_ref, mask_ref, bias_ref, out_ref, *,
                     mask_token):
    """All fused codebook tables resident in VMEM (single-buffered).

    codes_ref: (tile_t, nc) int32
    ftab_ref:  (nc, vocab_pad, d_pad) bf16   -- tables @ Wproj
    mask_ref:  (nc, d_pad) f32               -- mask_embedding @ Wproj
    bias_ref:  (1, d_pad) f32
    out_ref:   (tile_t, d_pad) f32           -- accumulated in place (no scratch)
    """
    nc, vocab_pad, d_pad = ftab_ref.shape
    tile_t = out_ref.shape[0]
    vocab_iota = lax.broadcasted_iota(jnp.int32, (tile_t, vocab_pad), 1)

    out_ref[...] = jnp.broadcast_to(bias_ref[...], (tile_t, d_pad))
    for i in range(nc):  # nc is small and static -> unrolled
        c = codes_ref[:, i:i + 1]                           # (tile_t, 1)
        # Embedding gather + 1x1-conv projection as one one-hot MXU matmul.
        onehot = (c == vocab_iota).astype(jnp.bfloat16)     # (tile_t, vocab_pad)
        contrib = jnp.dot(onehot, ftab_ref[i],
                          preferred_element_type=jnp.float32)
        # MASK token handled on the VPU; its row is not part of the matmul K.
        contrib = contrib + jnp.where(c == mask_token,
                                      mask_ref[i:i + 1, :], 0.0)
        out_ref[...] += contrib


def _stream_kernel(codes_ref, ftab_ref, mask_ref, bias_ref, out_ref, *,
                   mask_token, n_codebooks):
    """One codebook table per grid step; codebook axis is the reduction axis.

    codes_ref: (tile_t, nc) int32          -- resident across k
    ftab_ref:  (vocab_pad, d_pad) bf16     -- codebook k (streamed, 2-buffered)
    mask_ref:  (nc, d_pad) f32
    bias_ref:  (1, d_pad) f32
    out_ref:   (tile_t, d_pad) f32         -- resident accumulator across k
    """
    k = pl.program_id(2)
    vocab_pad = ftab_ref.shape[0]
    tile_t, d_pad = out_ref.shape

    @pl.when(k == 0)
    def _init():
        out_ref[...] = jnp.broadcast_to(bias_ref[...], (tile_t, d_pad))

    # Select codebook k's code column / mask row (nc is small and static).
    c = codes_ref[:, 0:1]
    mrow = mask_ref[0:1, :]
    for j in range(1, n_codebooks):
        sel = k == j
        c = jnp.where(sel, codes_ref[:, j:j + 1], c)
        mrow = jnp.where(sel, mask_ref[j:j + 1, :], mrow)

    vocab_iota = lax.broadcasted_iota(jnp.int32, (tile_t, vocab_pad), 1)
    onehot = (c == vocab_iota).astype(jnp.bfloat16)
    contrib = jnp.dot(onehot, ftab_ref[...], preferred_element_type=jnp.float32)
    contrib = contrib + jnp.where(c == mask_token, mrow, 0.0)
    out_ref[...] += contrib


# --------------------------------------------------------------------------
# Parameter preparation (once per parameter update) and forward (hot path)
# --------------------------------------------------------------------------
def prepare_codebook_embedding_params(tables, mask_embedding, conv_w, conv_b,
                                      mask_token):
    """One-time weight transform: fold the 1x1 Conv1d into the tables."""
    nc, vocab_p1, d_model = tables.shape
    vocab_size = vocab_p1 - 1
    mask_token = int(mask_token)

    # Rows reachable by a *non-mask* code; the MASK contribution is added on
    # the VPU inside the kernel, so its row stays out of the matmul K dim.
    needed = vocab_size if mask_token == vocab_size else vocab_p1
    vocab_pad = _round_up(max(needed, 1), 128)
    d_pad = _round_up(d_model, 128)

    # Conv1d weight [d_out, nc*d_model, 1] -> per-codebook [nc, d_model, d_out]
    # (channel layout matches the module's permute(0,1,3,2).reshape).
    wproj = jnp.transpose(
        conv_w[..., 0].astype(jnp.float32).reshape(d_model, nc, d_model),
        (1, 2, 0))

    tabs = tables.astype(jnp.float32)
    if mask_token < needed:
        tabs = tabs.at[:, mask_token, :].set(0.0)   # shadowed by MASK override
    tabs = tabs[:, :needed, :]

    fused = jnp.einsum('nvd,ndo->nvo', tabs, wproj)           # [nc, needed, d]
    fused = jnp.pad(fused, ((0, 0), (0, vocab_pad - needed),
                            (0, d_pad - d_model))).astype(jnp.bfloat16)

    mask_rows = jnp.einsum('nd,ndo->no',
                           mask_embedding.astype(jnp.float32), wproj)
    mask_rows = jnp.pad(mask_rows, ((0, 0), (0, d_pad - d_model)))

    bias = jnp.pad(conv_b.astype(jnp.float32),
                   (0, d_pad - d_model)).reshape(1, d_pad)

    return dict(fused_tables=fused, mask_rows=mask_rows, bias=bias,
                n_codebooks=nc, vocab_size=vocab_size, d_model=d_model,
                vocab_pad=vocab_pad, d_pad=d_pad, mask_token=mask_token)


def codebook_embedding_forward(codes, params, *, tile_t=None,
                               force_stream=False):
    """codes: [B, n_codebooks, T] int -> [B, T, d_model] f32."""
    B, nc, T = codes.shape
    assert nc == params["n_codebooks"], (nc, params["n_codebooks"])
    fused = params["fused_tables"]
    mask_rows = params["mask_rows"]
    bias = params["bias"]
    vocab_pad, d_pad = params["vocab_pad"], params["d_pad"]
    d_model, mask_token = params["d_model"], params["mask_token"]

    if tile_t is None:
        tile_t = _choose_tile_t(T, B)
    T_pad = _round_up(T, tile_t)
    n_t = T_pad // tile_t

    codes_tm = jnp.transpose(codes, (0, 2, 1)).astype(jnp.int32)    # [B, T, nc]
    if T_pad != T:
        # Pad with token 0 (a real row); padded rows are sliced off below.
        codes_tm = jnp.pad(codes_tm, ((0, 0), (0, T_pad - T), (0, 0)))

    # ---- Generation-aware VMEM budget and strategy selection.
    capacity = _vmem_capacity_bytes()
    table_bytes = nc * vocab_pad * d_pad * 2                 # bf16 fused tables
    common = (2 * tile_t * 128 * 4                           # codes blocks x2 (lane-padded i32)
              + 2 * tile_t * d_pad * 4                       # out blocks x2
              + 2 * _round_up(nc, 8) * d_pad * 4             # mask rows x2
              + 2 * 8 * d_pad * 4                            # bias x2
              + tile_t * vocab_pad * 4                       # one-hot working set
              + tile_t * d_pad * 4)                          # matmul result temp
    resident_ws = table_bytes + common                       # table single-buffered
    stream_ws = 2 * vocab_pad * d_pad * 2 + common           # per-codebook stream
    use_resident = (not force_stream) and resident_ws <= int(0.8 * capacity)

    out_shape = jax.ShapeDtypeStruct((B, T_pad, d_pad), jnp.float32)

    if use_resident:
        kernel = functools.partial(_resident_kernel, mask_token=mask_token)

        def _run(single_buffered, working_set):
            if single_buffered:
                # Constant index_map -> block never changes across the grid;
                # a single buffer halves the resident table footprint.
                ftab_spec = pl.BlockSpec(
                    (nc, vocab_pad, d_pad), lambda b, t: (0, 0, 0),
                    pipeline_mode=pl.Buffered(buffer_count=1))
            else:
                ftab_spec = pl.BlockSpec((nc, vocab_pad, d_pad),
                                         lambda b, t: (0, 0, 0))
            return pl.pallas_call(
                kernel,
                out_shape=out_shape,
                grid=(B, n_t),
                in_specs=[
                    pl.BlockSpec((pl.Squeezed(), tile_t, nc),
                                 lambda b, t: (b, t, 0)),
                    ftab_spec,
                    pl.BlockSpec((nc, d_pad), lambda b, t: (0, 0)),
                    pl.BlockSpec((1, d_pad), lambda b, t: (0, 0)),
                ],
                out_specs=pl.BlockSpec((pl.Squeezed(), tile_t, d_pad),
                                       lambda b, t: (b, t, 0)),
                compiler_params=pltpu.CompilerParams(
                    dimension_semantics=("parallel", "parallel"),
                    vmem_limit_bytes=_vmem_limit(working_set, capacity)),
            )(codes_tm, fused, mask_rows, bias)

        try:
            out = _run(True, resident_ws)
        except Exception:
            # pl.Buffered(1) unsupported by this jax/Mosaic build: fall back
            # to the default double-buffered (still constant-index) table.
            out = _run(False, resident_ws + table_bytes)
    else:
        kernel = functools.partial(_stream_kernel, mask_token=mask_token,
                                   n_codebooks=nc)
        out = pl.pallas_call(
            kernel,
            out_shape=out_shape,
            grid=(B, n_t, nc),            # codebook axis last = reduction axis
            in_specs=[
                pl.BlockSpec((pl.Squeezed(), tile_t, nc),
                             lambda b, t, k: (b, t, 0)),
                pl.BlockSpec((pl.Squeezed(), vocab_pad, d_pad),
                             lambda b, t, k: (k, 0, 0)),
                pl.BlockSpec((nc, d_pad), lambda b, t, k: (0, 0)),
                pl.BlockSpec((1, d_pad), lambda b, t, k: (0, 0)),
            ],
            out_specs=pl.BlockSpec((pl.Squeezed(), tile_t, d_pad),
                                   lambda b, t, k: (b, t, 0)),
            compiler_params=pltpu.CompilerParams(
                dimension_semantics=("parallel", "parallel", "arbitrary"),
                vmem_limit_bytes=_vmem_limit(stream_ws, capacity)),
        )(codes_tm, fused, mask_rows, bias)

    if T_pad != T or d_pad != d_model:
        out = out[:, :T, :d_model]
    return out


# --------------------------------------------------------------------------
# Pure-JAX reference (mirrors the PyTorch forward) and self-test
# --------------------------------------------------------------------------
def reference_forward(codes, tables, mask_embedding, conv_w, conv_b,
                      mask_token):
    B, nc, T = codes.shape
    d_model = tables.shape[-1]
    embs = []
    for i in range(nc):
        cb = codes[:, i, :]
        e = tables[i][cb]                                    # [B, T, d]
        e = jnp.where((cb == mask_token)[..., None], mask_embedding[i], e)
        embs.append(e)
    all_e = jnp.stack(embs, axis=1)                          # [B, nc, T, d]
    all_e = jnp.transpose(all_e, (0, 1, 3, 2)).reshape(B, nc * d_model, T)
    w = conv_w[..., 0]                                       # [d, nc*d]
    out = jnp.einsum('oc,bct->bot', w, all_e) + conv_b[None, :, None]
    return jnp.transpose(out, (0, 2, 1))                     # [B, T, d]


if __name__ == "__main__":
    B, n_codebooks, seq_len = 2, 4, 16
    vocab_size, d_model = 16, 32
    mask_token = vocab_size          # tables have vocab_size + 1 rows

    key = jax.random.PRNGKey(0)
    k_codes, k_tab, k_mask, k_w, k_b = jax.random.split(key, 5)

    tables = jax.random.normal(
        k_tab, (n_codebooks, vocab_size + 1, d_model), jnp.float32)
    mask_embedding = jax.random.normal(
        k_mask, (n_codebooks, d_model), jnp.float32)
    conv_w = 0.1 * jax.random.normal(
        k_w, (d_model, n_codebooks * d_model, 1), jnp.float32)
    conv_b = 0.1 * jax.random.normal(k_b, (d_model,), jnp.float32)
    codes = jax.random.randint(
        k_codes, (B, n_codebooks, seq_len), 0, vocab_size + 1, jnp.int32)

    params = prepare_codebook_embedding_params(
        tables, mask_embedding, conv_w, conv_b, mask_token)

    ref = jax.block_until_ready(
        reference_forward(codes, tables, mask_embedding, conv_w, conv_b,
                          mask_token))

    # Resident-table path (what small/medium configs select automatically).
    out = jax.block_until_ready(codebook_embedding_forward(codes, params))
    assert out.shape == (B, seq_len, d_model), out.shape
    err = float(jnp.max(jnp.abs(out - ref)))
    assert jnp.allclose(out, ref, rtol=2e-2, atol=2e-2), ("resident", err)

    # Also exercise the streamed-codebook (large-table / v7x) path.
    out_s = jax.block_until_ready(
        codebook_embedding_forward(codes, params, force_stream=True))
    err_s = float(jnp.max(jnp.abs(out_s - ref)))
    assert jnp.allclose(out_s, ref, rtol=2e-2, atol=2e-2), ("stream", err_s)

    print("KERNEL_OK")
</pallas_src>

<mosaic_0001>
module attributes {stable_mosaic.version = 11 : i64} {
  func.func @_resident_kernel(%arg0: i32, %arg1: i32, %arg2: memref<1x16x4xi32, #tpu.memory_space<vmem>>, %arg3: memref<4x128x128xbf16, #tpu.memory_space<vmem>>, %arg4: memref<4x128xf32, #tpu.memory_space<vmem>>, %arg5: memref<1x128xf32, #tpu.memory_space<vmem>>, %arg6: memref<1x16x128xf32, #tpu.memory_space<vmem>>) attributes {dimension_semantics = [#tpu.dimension_semantics<parallel>, #tpu.dimension_semantics<parallel>], iteration_bounds = array<i64: 2, 1>, scalar_prefetch = 0 : i64, scratch_operands = 0 : i64, tpu.core_type = #tpu.core_type<tc>, window_params = [{transform_indices = @transform_0, window_bounds = array<i64: 1, 16, 4>}, {pipeline_mode = #tpu.pipeline_mode<synchronous>, transform_indices = @transform_1, window_bounds = array<i64: 4, 128, 128>}, {pipeline_mode = #tpu.pipeline_mode<synchronous>, transform_indices = @transform_2, window_bounds = array<i64: 4, 128>}, {pipeline_mode = #tpu.pipeline_mode<synchronous>, transform_indices = @transform_3, window_bounds = array<i64: 1, 128>}, {transform_indices = @transform_4, window_bounds = array<i64: 1, 16, 128>}]} {
    %0 = tpu.iota {dimensions = array<i32: 1>} : vector<16x128xi32>
    %c0 = arith.constant 0 : index
    %c0_0 = arith.constant 0 : index
    %1 = vector.load %arg5[%c0, %c0_0] : memref<1x128xf32, #tpu.memory_space<vmem>>, vector<1x128xf32>
    %2 = vector.shape_cast %1 : vector<1x128xf32> to vector<1x128xf32>
    %3 = vector.broadcast %2 : vector<1x128xf32> to vector<16x128xf32>
    %c0_1 = arith.constant 0 : index
    %c0_2 = arith.constant 0 : index
    %c0_3 = arith.constant 0 : index
    %4 = vector.load %arg6[%c0_1, %c0_2, %c0_3] : memref<1x16x128xf32, #tpu.memory_space<vmem>>, vector<1x16x128xf32>
    %5 = vector.shape_cast %4 : vector<1x16x128xf32> to vector<16x128xf32>
    %6 = vector.shape_cast %3 : vector<16x128xf32> to vector<1x16x128xf32>
    tpu.vector_store %arg6[%c0_1, %c0_2, %c0_3], %6 {strides = array<i32>} : memref<1x16x128xf32, #tpu.memory_space<vmem>>, vector<1x16x128xf32>,
    %c0_4 = arith.constant 0 : index
    %c0_5 = arith.constant 0 : index
    %c0_6 = arith.constant 0 : index
    %7 = vector.load %arg2[%c0_4, %c0_5, %c0_6] : memref<1x16x4xi32, #tpu.memory_space<vmem>>, vector<1x16x1xi32>
    %8 = vector.shape_cast %7 : vector<1x16x1xi32> to vector<16x1xi32>
    %9 = vector.broadcast %8 : vector<16x1xi32> to vector<16x128xi32>
    %10 = arith.cmpi eq, %9, %0 : vector<16x128xi32>
    %11 = arith.extui %10 : vector<16x128xi1> to vector<16x128xi32>
    %12 = arith.sitofp %11 : vector<16x128xi32> to vector<16x128xf32>
    %13 = arith.truncf %12 : vector<16x128xf32> to vector<16x128xbf16>
    %c0_7 = arith.constant 0 : index
    %c0_8 = arith.constant 0 : index
    %c0_9 = arith.constant 0 : index
    %14 = vector.load %arg3[%c0_7, %c0_8, %c0_9] : memref<4x128x128xbf16, #tpu.memory_space<vmem>>, vector<1x128x128xbf16>
    %15 = vector.shape_cast %14 : vector<1x128x128xbf16> to vector<128x128xbf16>
    %cst = arith.constant dense<0.000000e+00> : vector<16x128xf32>
    %16 = tpu.matmul %13, %15, %cst {dimension_numbers = #tpu.dot_dimension_numbers<[1], [0], [0], [1], [0, 0, 1, 1], [], []>} : vector<16x128xbf16>, vector<128x128xbf16>, vector<16x128xf32> -> vector<16x128xf32>
    %c16_i32 = arith.constant 16 : i32
    %17 = vector.broadcast %c16_i32 : i32 to vector<16x1xi32>
    %18 = arith.cmpi eq, %8, %17 : vector<16x1xi32>
    %c0_10 = arith.constant 0 : index
    %c0_11 = arith.constant 0 : index
    %19 = vector.load %arg4[%c0_10, %c0_11] : memref<4x128xf32, #tpu.memory_space<vmem>>, vector<1x128xf32>
    %cst_12 = arith.constant 0.000000e+00 : f32
    %20 = vector.shape_cast %18 : vector<16x1xi1> to vector<16x1xi1>
    %21 = vector.broadcast %20 : vector<16x1xi1> to vector<16x128xi1>
    %22 = vector.shape_cast %19 : vector<1x128xf32> to vector<1x128xf32>
    %23 = vector.broadcast %22 : vector<1x128xf32> to vector<16x128xf32>
    %24 = vector.broadcast %cst_12 : f32 to vector<16x128xf32>
    %25 = arith.select %21, %23, %24 : vector<16x128xi1>, vector<16x128xf32>
    %26 = arith.addf %16, %25 : vector<16x128xf32>
    %c0_13 = arith.constant 0 : index
    %c0_14 = arith.constant 0 : index
    %c0_15 = arith.constant 0 : index
    %27 = vector.load %arg6[%c0_13, %c0_14, %c0_15] : memref<1x16x128xf32, #tpu.memory_space<vmem>>, vector<1x16x128xf32>
    %28 = vector.shape_cast %27 : vector<1x16x128xf32> to vector<16x128xf32>
    %29 = arith.addf %28, %26 : vector<16x128xf32>
    %c0_16 = arith.constant 0 : index
    %c0_17 = arith.constant 0 : index
    %c0_18 = arith.constant 0 : index
    %30 = vector.load %arg6[%c0_16, %c0_17, %c0_18] : memref<1x16x128xf32, #tpu.memory_space<vmem>>, vector<1x16x128xf32>
    %31 = vector.shape_cast %30 : vector<1x16x128xf32> to vector<16x128xf32>
    %32 = vector.shape_cast %29 : vector<16x128xf32> to vector<1x16x128xf32>
    tpu.vector_store %arg6[%c0_16, %c0_17, %c0_18], %32 {strides = array<i32>} : memref<1x16x128xf32, #tpu.memory_space<vmem>>, vector<1x16x128xf32>,
    %c0_19 = arith.constant 0 : index
    %c0_20 = arith.constant 0 : index
    %c1 = arith.constant 1 : index
    %33 = vector.load %arg2[%c0_19, %c0_20, %c1] : memref<1x16x4xi32, #tpu.memory_space<vmem>>, vector<1x16x1xi32>
    %34 = vector.shape_cast %33 : vector<1x16x1xi32> to vector<16x1xi32>
    %35 = vector.broadcast %34 : vector<16x1xi32> to vector<16x128xi32>
    %36 = arith.cmpi eq, %35, %0 : vector<16x128xi32>
    %37 = arith.extui %36 : vector<16x128xi1> to vector<16x128xi32>
    %38 = arith.sitofp %37 : vector<16x128xi32> to vector<16x128xf32>
    %39 = arith.truncf %38 : vector<16x128xf32> to vector<16x128xbf16>
    %c1_21 = arith.constant 1 : index
    %c0_22 = arith.constant 0 : index
    %c0_23 = arith.constant 0 : index
    %40 = vector.load %arg3[%c1_21, %c0_22, %c0_23] : memref<4x128x128xbf16, #tpu.memory_space<vmem>>, vector<1x128x128xbf16>
    %41 = vector.shape_cast %40 : vector<1x128x128xbf16> to vector<128x128xbf16>
    %cst_24 = arith.constant dense<0.000000e+00> : vector<16x128xf32>
    %42 = tpu.matmul %39, %41, %cst_24 {dimension_numbers = #tpu.dot_dimension_numbers<[1], [0], [0], [1], [0, 0, 1, 1], [], []>} : vector<16x128xbf16>, vector<128x128xbf16>, vector<16x128xf32> -> vector<16x128xf32>
    %c16_i32_25 = arith.constant 16 : i32
    %43 = vector.broadcast %c16_i32_25 : i32 to vector<16x1xi32>
    %44 = arith.cmpi eq, %34, %43 : vector<16x1xi32>
    %c1_26 = arith.constant 1 : index
    %c0_27 = arith.constant 0 : index
    %45 = vector.load %arg4[%c1_26, %c0_27] : memref<4x128xf32, #tpu.memory_space<vmem>>, vector<1x128xf32>
    %cst_28 = arith.constant 0.000000e+00 : f32
    %46 = vector.shape_cast %44 : vector<16x1xi1> to vector<16x1xi1>
    %47 = vector.broadcast %46 : vector<16x1xi1> to vector<16x128xi1>
    %48 = vector.shape_cast %45 : vector<1x128xf32> to vector<1x128xf32>
    %49 = vector.broadcast %48 : vector<1x128xf32> to vector<16x128xf32>
    %50 = vector.broadcast %cst_28 : f32 to vector<16x128xf32>
    %51 = arith.select %47, %49, %50 : vector<16x128xi1>, vector<16x128xf32>
    %52 = arith.addf %42, %51 : vector<16x128xf32>
    %c0_29 = arith.constant 0 : index
    %c0_30 = arith.constant 0 : index
    %c0_31 = arith.constant 0 : index
    %53 = vector.load %arg6[%c0_29, %c0_30, %c0_31] : memref<1x16x128xf32, #tpu.memory_space<vmem>>, vector<1x16x128xf32>
    %54 = vector.shape_cast %53 : vector<1x16x128xf32> to vector<16x128xf32>
    %55 = arith.addf %54, %52 : vector<16x128xf32>
    %c0_32 = arith.constant 0 : index
    %c0_33 = arith.constant 0 : index
    %c0_34 = arith.constant 0 : index
    %56 = vector.load %arg6[%c0_32, %c0_33, %c0_34] : memref<1x16x128xf32, #tpu.memory_space<vmem>>, vector<1x16x128xf32>
    %57 = vector.shape_cast %56 : vector<1x16x128xf32> to vector<16x128xf32>
    %58 = vector.shape_cast %55 : vector<16x128xf32> to vector<1x16x128xf32>
    tpu.vector_store %arg6[%c0_32, %c0_33, %c0_34], %58 {strides = array<i32>} : memref<1x16x128xf32, #tpu.memory_space<vmem>>, vector<1x16x128xf32>,
    %c0_35 = arith.constant 0 : index
    %c0_36 = arith.constant 0 : index
    %c2 = arith.constant 2 : index
    %59 = vector.load %arg2[%c0_35, %c0_36, %c2] : memref<1x16x4xi32, #tpu.memory_space<vmem>>, vector<1x16x1xi32>
    %60 = vector.shape_cast %59 : vector<1x16x1xi32> to vector<16x1xi32>
    %61 = vector.broadcast %60 : vector<16x1xi32> to vector<16x128xi32>
    %62 = arith.cmpi eq, %61, %0 : vector<16x128xi32>
    %63 = arith.extui %62 : vector<16x128xi1> to vector<16x128xi32>
    %64 = arith.sitofp %63 : vector<16x128xi32> to vector<16x128xf32>
    %65 = arith.truncf %64 : vector<16x128xf32> to vector<16x128xbf16>
    %c2_37 = arith.constant 2 : index
    %c0_38 = arith.constant 0 : index
    %c0_39 = arith.constant 0 : index
    %66 = vector.load %arg3[%c2_37, %c0_38, %c0_39] : memref<4x128x128xbf16, #tpu.memory_space<vmem>>, vector<1x128x128xbf16>
    %67 = vector.shape_cast %66 : vector<1x128x128xbf16> to vector<128x128xbf16>
    %cst_40 = arith.constant dense<0.000000e+00> : vector<16x128xf32>
    %68 = tpu.matmul %65, %67, %cst_40 {dimension_numbers = #tpu.dot_dimension_numbers<[1], [0], [0], [1], [0, 0, 1, 1], [], []>} : vector<16x128xbf16>, vector<128x128xbf16>, vector<16x128xf32> -> vector<16x128xf32>
    %c16_i32_41 = arith.constant 16 : i32
    %69 = vector.broadcast %c16_i32_41 : i32 to vector<16x1xi32>
    %70 = arith.cmpi eq, %60, %69 : vector<16x1xi32>
    %c2_42 = arith.constant 2 : index
    %c0_43 = arith.constant 0 : index
    %71 = vector.load %arg4[%c2_42, %c0_43] : memref<4x128xf32, #tpu.memory_space<vmem>>, vector<1x128xf32>
    %cst_44 = arith.constant 0.000000e+00 : f32
    %72 = vector.shape_cast %70 : vector<16x1xi1> to vector<16x1xi1>
    %73 = vector.broadcast %72 : vector<16x1xi1> to vector<16x128xi1>
    %74 = vector.shape_cast %71 : vector<1x128xf32> to vector<1x128xf32>
    %75 = vector.broadcast %74 : vector<1x128xf32> to vector<16x128xf32>
    %76 = vector.broadcast %cst_44 : f32 to vector<16x128xf32>
    %77 = arith.select %73, %75, %76 : vector<16x128xi1>, vector<16x128xf32>
    %78 = arith.addf %68, %77 : vector<16x128xf32>
    %c0_45 = arith.constant 0 : index
    %c0_46 = arith.constant 0 : index
    %c0_47 = arith.constant 0 : index
    %79 = vector.load %arg6[%c0_45, %c0_46, %c0_47] : memref<1x16x128xf32, #tpu.memory_space<vmem>>, vector<1x16x128xf32>
    %80 = vector.shape_cast %79 : vector<1x16x128xf32> to vector<16x128xf32>
    %81 = arith.addf %80, %78 : vector<16x128xf32>
    %c0_48 = arith.constant 0 : index
    %c0_49 = arith.constant 0 : index
    %c0_50 = arith.constant 0 : index
    %82 = vector.load %arg6[%c0_48, %c0_49, %c0_50] : memref<1x16x128xf32, #tpu.memory_space<vmem>>, vector<1x16x128xf32>
    %83 = vector.shape_cast %82 : vector<1x16x128xf32> to vector<16x128xf32>
    %84 = vector.shape_cast %81 : vector<16x128xf32> to vector<1x16x128xf32>
    tpu.vector_store %arg6[%c0_48, %c0_49, %c0_50], %84 {strides = array<i32>} : memref<1x16x128xf32, #tpu.memory_space<vmem>>, vector<1x16x128xf32>,
    %c0_51 = arith.constant 0 : index
    %c0_52 = arith.constant 0 : index
    %c3 = arith.constant 3 : index
    %85 = vector.load %arg2[%c0_51, %c0_52, %c3] : memref<1x16x4xi32, #tpu.memory_space<vmem>>, vector<1x16x1xi32>
    %86 = vector.shape_cast %85 : vector<1x16x1xi32> to vector<16x1xi32>
    %87 = vector.broadcast %86 : vector<16x1xi32> to vector<16x128xi32>
    %88 = arith.cmpi eq, %87, %0 : vector<16x128xi32>
    %89 = arith.extui %88 : vector<16x128xi1> to vector<16x128xi32>
    %90 = arith.sitofp %89 : vector<16x128xi32> to vector<16x128xf32>
    %91 = arith.truncf %90 : vector<16x128xf32> to vector<16x128xbf16>
    %c3_53 = arith.constant 3 : index
    %c0_54 = arith.constant 0 : index
    %c0_55 = arith.constant 0 : index
    %92 = vector.load %arg3[%c3_53, %c0_54, %c0_55] : memref<4x128x128xbf16, #tpu.memory_space<vmem>>, vector<1x128x128xbf16>
    %93 = vector.shape_cast %92 : vector<1x128x128xbf16> to vector<128x128xbf16>
    %cst_56 = arith.constant dense<0.000000e+00> : vector<16x128xf32>
    %94 = tpu.matmul %91, %93, %cst_56 {dimension_numbers = #tpu.dot_dimension_numbers<[1], [0], [0], [1], [0, 0, 1, 1], [], []>} : vector<16x128xbf16>, vector<128x128xbf16>, vector<16x128xf32> -> vector<16x128xf32>
    %c16_i32_57 = arith.constant 16 : i32
    %95 = vector.broadcast %c16_i32_57 : i32 to vector<16x1xi32>
    %96 = arith.cmpi eq, %86, %95 : vector<16x1xi32>
    %c3_58 = arith.constant 3 : index
    %c0_59 = arith.constant 0 : index
    %97 = vector.load %arg4[%c3_58, %c0_59] : memref<4x128xf32, #tpu.memory_space<vmem>>, vector<1x128xf32>
    %cst_60 = arith.constant 0.000000e+00 : f32
    %98 = vector.shape_cast %96 : vector<16x1xi1> to vector<16x1xi1>
    %99 = vector.broadcast %98 : vector<16x1xi1> to vector<16x128xi1>
    %100 = vector.shape_cast %97 : vector<1x128xf32> to vector<1x128xf32>
    %101 = vector.broadcast %100 : vector<1x128xf32> to vector<16x128xf32>
    %102 = vector.broadcast %cst_60 : f32 to vector<16x128xf32>
    %103 = arith.select %99, %101, %102 : vector<16x128xi1>, vector<16x128xf32>
    %104 = arith.addf %94, %103 : vector<16x128xf32>
    %c0_61 = arith.constant 0 : index
    %c0_62 = arith.constant 0 : index
    %c0_63 = arith.constant 0 : index
    %105 = vector.load %arg6[%c0_61, %c0_62, %c0_63] : memref<1x16x128xf32, #tpu.memory_space<vmem>>, vector<1x16x128xf32>
    %106 = vector.shape_cast %105 : vector<1x16x128xf32> to vector<16x128xf32>
    %107 = arith.addf %106, %104 : vector<16x128xf32>
    %c0_64 = arith.constant 0 : index
    %c0_65 = arith.constant 0 : index
    %c0_66 = arith.constant 0 : index
    %108 = vector.load %arg6[%c0_64, %c0_65, %c0_66] : memref<1x16x128xf32, #tpu.memory_space<vmem>>, vector<1x16x128xf32>
    %109 = vector.shape_cast %108 : vector<1x16x128xf32> to vector<16x128xf32>
    %110 = vector.shape_cast %107 : vector<16x128xf32> to vector<1x16x128xf32>
    tpu.vector_store %arg6[%c0_64, %c0_65, %c0_66], %110 {strides = array<i32>} : memref<1x16x128xf32, #tpu.memory_space<vmem>>, vector<1x16x128xf32>,
    return
  }
  func.func @transform_0(%arg0: i32, %arg1: i32) -> (i32, i32, i32) {
    %c0_i32 = arith.constant 0 : i32
    %c0_i32_0 = arith.constant 0 : i32
    return %arg0, %arg1, %c0_i32 : i32, i32, i32
  }
  func.func @transform_1(%arg0: i32, %arg1: i32) -> (i32, i32, i32) {
    %c0_i32 = arith.constant 0 : i32
    %c0_i32_0 = arith.constant 0 : i32
    %c0_i32_1 = arith.constant 0 : i32
    %c0_i32_2 = arith.constant 0 : i32
    return %c0_i32, %c0_i32_0, %c0_i32_1 : i32, i32, i32
  }
  func.func @transform_2(%arg0: i32, %arg1: i32) -> (i32, i32) {
    %c0_i32 = arith.constant 0 : i32
    %c0_i32_0 = arith.constant 0 : i32
    %c0_i32_1 = arith.constant 0 : i32
    return %c0_i32, %c0_i32_0 : i32, i32
  }
  func.func @transform_3(%arg0: i32, %arg1: i32) -> (i32, i32) {
    %c0_i32 = arith.constant 0 : i32
    %c0_i32_0 = arith.constant 0 : i32
    %c0_i32_1 = arith.constant 0 : i32
    return %c0_i32, %c0_i32_0 : i32, i32
  }
  func.func @transform_4(%arg0: i32, %arg1: i32) -> (i32, i32, i32) {
    %c0_i32 = arith.constant 0 : i32
    %c0_i32_0 = arith.constant 0 : i32
    return %arg0, %arg1, %c0_i32 : i32, i32, i32
  }
}

module attributes {stable_mosaic.version = 11 : i64} {
  func.func @_resident_kernel(%arg0: i32, %arg1: i32, %arg2: memref<1x16x4xi32, #tpu.memory_space<vmem>>, %arg3: memref<4x128x128xbf16, #tpu.memory_space<vmem>>, %arg4: memref<4x128xf32, #tpu.memory_space<vmem>>, %arg5: memref<1x128xf32, #tpu.memory_space<vmem>>, %arg6: memref<1x16x128xf32, #tpu.memory_space<vmem>>) attributes {dimension_semantics = [#tpu.dimension_semantics<parallel>, #tpu.dimension_semantics<parallel>], iteration_bounds = array<i64: 2, 1>, scalar_prefetch = 0 : i64, scratch_operands = 0 : i64, tpu.core_type = #tpu.core_type<tc>, window_params = [{transform_indices = @transform_0, window_bounds = array<i64: 1, 16, 4>}, {pipeline_mode = #tpu.pipeline_mode<synchronous>, transform_indices = @transform_1, window_bounds = array<i64: 4, 128, 128>}, {pipeline_mode = #tpu.pipeline_mode<synchronous>, transform_indices = @transform_2, window_bounds = array<i64: 4, 128>}, {pipeline_mode = #tpu.pipeline_mode<synchronous>, transform_indices = @transform_3, window_bounds = array<i64: 1, 128>}, {transform_indices = @transform_4, window_bounds = array<i64: 1, 16, 128>}]} {
    %0 = tpu.iota {dimensions = array<i32: 1>} : vector<16x128xi32>
    %c0 = arith.constant 0 : index
    %c0_0 = arith.constant 0 : index
    %1 = vector.load %arg5[%c0, %c0_0] : memref<1x128xf32, #tpu.memory_space<vmem>>, vector<1x128xf32>
    %2 = vector.shape_cast %1 : vector<1x128xf32> to vector<1x128xf32>
    %3 = vector.broadcast %2 : vector<1x128xf32> to vector<16x128xf32>
    %c0_1 = arith.constant 0 : index
    %c0_2 = arith.constant 0 : index
    %c0_3 = arith.constant 0 : index
    %4 = vector.load %arg6[%c0_1, %c0_2, %c0_3] : memref<1x16x128xf32, #tpu.memory_space<vmem>>, vector<1x16x128xf32>
    %5 = vector.shape_cast %4 : vector<1x16x128xf32> to vector<16x128xf32>
    %6 = vector.shape_cast %3 : vector<16x128xf32> to vector<1x16x128xf32>
    tpu.vector_store %arg6[%c0_1, %c0_2, %c0_3], %6 {strides = array<i32>} : memref<1x16x128xf32, #tpu.memory_space<vmem>>, vector<1x16x128xf32>,
    %c0_4 = arith.constant 0 : index
    %c0_5 = arith.constant 0 : index
    %c0_6 = arith.constant 0 : index
    %7 = vector.load %arg2[%c0_4, %c0_5, %c0_6] : memref<1x16x4xi32, #tpu.memory_space<vmem>>, vector<1x16x1xi32>
    %8 = vector.shape_cast %7 : vector<1x16x1xi32> to vector<16x1xi32>
    %9 = vector.broadcast %8 : vector<16x1xi32> to vector<16x128xi32>
    %10 = arith.cmpi eq, %9, %0 : vector<16x128xi32>
    %11 = arith.extui %10 : vector<16x128xi1> to vector<16x128xi32>
    %12 = arith.sitofp %11 : vector<16x128xi32> to vector<16x128xf32>
    %13 = arith.truncf %12 : vector<16x128xf32> to vector<16x128xbf16>
    %c0_7 = arith.constant 0 : index
    %c0_8 = arith.constant 0 : index
    %c0_9 = arith.constant 0 : index
    %14 = vector.load %arg3[%c0_7, %c0_8, %c0_9] : memref<4x128x128xbf16, #tpu.memory_space<vmem>>, vector<1x128x128xbf16>
    %15 = vector.shape_cast %14 : vector<1x128x128xbf16> to vector<128x128xbf16>
    %cst = arith.constant dense<0.000000e+00> : vector<16x128xf32>
    %16 = tpu.matmul %13, %15, %cst {dimension_numbers = #tpu.dot_dimension_numbers<[1], [0], [0], [1], [0, 0, 1, 1], [], []>} : vector<16x128xbf16>, vector<128x128xbf16>, vector<16x128xf32> -> vector<16x128xf32>
    %c16_i32 = arith.constant 16 : i32
    %17 = vector.broadcast %c16_i32 : i32 to vector<16x1xi32>
    %18 = arith.cmpi eq, %8, %17 : vector<16x1xi32>
    %c0_10 = arith.constant 0 : index
    %c0_11 = arith.constant 0 : index
    %19 = vector.load %arg4[%c0_10, %c0_11] : memref<4x128xf32, #tpu.memory_space<vmem>>, vector<1x128xf32>
    %cst_12 = arith.constant 0.000000e+00 : f32
    %20 = vector.shape_cast %18 : vector<16x1xi1> to vector<16x1xi1>
    %21 = vector.broadcast %20 : vector<16x1xi1> to vector<16x128xi1>
    %22 = vector.shape_cast %19 : vector<1x128xf32> to vector<1x128xf32>
    %23 = vector.broadcast %22 : vector<1x128xf32> to vector<16x128xf32>
    %24 = vector.broadcast %cst_12 : f32 to vector<16x128xf32>
    %25 = arith.select %21, %23, %24 : vector<16x128xi1>, vector<16x128xf32>
    %26 = arith.addf %16, %25 : vector<16x128xf32>
    %c0_13 = arith.constant 0 : index
    %c0_14 = arith.constant 0 : index
    %c0_15 = arith.constant 0 : index
    %27 = vector.load %arg6[%c0_13, %c0_14, %c0_15] : memref<1x16x128xf32, #tpu.memory_space<vmem>>, vector<1x16x128xf32>
    %28 = vector.shape_cast %27 : vector<1x16x128xf32> to vector<16x128xf32>
    %29 = arith.addf %28, %26 : vector<16x128xf32>
    %c0_16 = arith.constant 0 : index
    %c0_17 = arith.constant 0 : index
    %c0_18 = arith.constant 0 : index
    %30 = vector.load %arg6[%c0_16, %c0_17, %c0_18] : memref<1x16x128xf32, #tpu.memory_space<vmem>>, vector<1x16x128xf32>
    %31 = vector.shape_cast %30 : vector<1x16x128xf32> to vector<16x128xf32>
    %32 = vector.shape_cast %29 : vector<16x128xf32> to vector<1x16x128xf32>
    tpu.vector_store %arg6[%c0_16, %c0_17, %c0_18], %32 {strides = array<i32>} : memref<1x16x128xf32, #tpu.memory_space<vmem>>, vector<1x16x128xf32>,
    %c0_19 = arith.constant 0 : index
    %c0_20 = arith.constant 0 : index
    %c1 = arith.constant 1 : index
    %33 = vector.load %arg2[%c0_19, %c0_20, %c1] : memref<1x16x4xi32, #tpu.memory_space<vmem>>, vector<1x16x1xi32>
    %34 = vector.shape_cast %33 : vector<1x16x1xi32> to vector<16x1xi32>
    %35 = vector.broadcast %34 : vector<16x1xi32> to vector<16x128xi32>
    %36 = arith.cmpi eq, %35, %0 : vector<16x128xi32>
    %37 = arith.extui %36 : vector<16x128xi1> to vector<16x128xi32>
    %38 = arith.sitofp %37 : vector<16x128xi32> to vector<16x128xf32>
    %39 = arith.truncf %38 : vector<16x128xf32> to vector<16x128xbf16>
    %c1_21 = arith.constant 1 : index
    %c0_22 = arith.constant 0 : index
    %c0_23 = arith.constant 0 : index
    %40 = vector.load %arg3[%c1_21, %c0_22, %c0_23] : memref<4x128x128xbf16, #tpu.memory_space<vmem>>, vector<1x128x128xbf16>
    %41 = vector.shape_cast %40 : vector<1x128x128xbf16> to vector<128x128xbf16>
    %cst_24 = arith.constant dense<0.000000e+00> : vector<16x128xf32>
    %42 = tpu.matmul %39, %41, %cst_24 {dimension_numbers = #tpu.dot_dimension_numbers<[1], [0], [0], [1], [0, 0, 1, 1], [], []>} : vector<16x128xbf16>, vector<128x128xbf16>, vector<16x128xf32> -> vector<16x128xf32>
    %c16_i32_25 = arith.constant 16 : i32
    %43 = vector.broadcast %c16_i32_25 : i32 to vector<16x1xi32>
    %44 = arith.cmpi eq, %34, %43 : vector<16x1xi32>
    %c1_26 = arith.constant 1 : index
    %c0_27 = arith.constant 0 : index
    %45 = vector.load %arg4[%c1_26, %c0_27] : memref<4x128xf32, #tpu.memory_space<vmem>>, vector<1x128xf32>
    %cst_28 = arith.constant 0.000000e+00 : f32
    %46 = vector.shape_cast %44 : vector<16x1xi1> to vector<16x1xi1>
    %47 = vector.broadcast %46 : vector<16x1xi1> to vector<16x128xi1>
    %48 = vector.shape_cast %45 : vector<1x128xf32> to vector<1x128xf32>
    %49 = vector.broadcast %48 : vector<1x128xf32> to vector<16x128xf32>
    %50 = vector.broadcast %cst_28 : f32 to vector<16x128xf32>
    %51 = arith.select %47, %49, %50 : vector<16x128xi1>, vector<16x128xf32>
    %52 = arith.addf %42, %51 : vector<16x128xf32>
    %c0_29 = arith.constant 0 : index
    %c0_30 = arith.constant 0 : index
    %c0_31 = arith.constant 0 : index
    %53 = vector.load %arg6[%c0_29, %c0_30, %c0_31] : memref<1x16x128xf32, #tpu.memory_space<vmem>>, vector<1x16x128xf32>
    %54 = vector.shape_cast %53 : vector<1x16x128xf32> to vector<16x128xf32>
    %55 = arith.addf %54, %52 : vector<16x128xf32>
    %c0_32 = arith.constant 0 : index
    %c0_33 = arith.constant 0 : index
    %c0_34 = arith.constant 0 : index
    %56 = vector.load %arg6[%c0_32, %c0_33, %c0_34] : memref<1x16x128xf32, #tpu.memory_space<vmem>>, vector<1x16x128xf32>
    %57 = vector.shape_cast %56 : vector<1x16x128xf32> to vector<16x128xf32>
    %58 = vector.shape_cast %55 : vector<16x128xf32> to vector<1x16x128xf32>
    tpu.vector_store %arg6[%c0_32, %c0_33, %c0_34], %58 {strides = array<i32>} : memref<1x16x128xf32, #tpu.memory_space<vmem>>, vector<1x16x128xf32>,
    %c0_35 = arith.constant 0 : index
    %c0_36 = arith.constant 0 : index
    %c2 = arith.constant 2 : index
    %59 = vector.load %arg2[%c0_35, %c0_36, %c2] : memref<1x16x4xi32, #tpu.memory_space<vmem>>, vector<1x16x1xi32>
    %60 = vector.shape_cast %59 : vector<1x16x1xi32> to vector<16x1xi32>
    %61 = vector.broadcast %60 : vector<16x1xi32> to vector<16x128xi32>
    %62 = arith.cmpi eq, %61, %0 : vector<16x128xi32>
    %63 = arith.extui %62 : vector<16x128xi1> to vector<16x128xi32>
    %64 = arith.sitofp %63 : vector<16x128xi32> to vector<16x128xf32>
    %65 = arith.truncf %64 : vector<16x128xf32> to vector<16x128xbf16>
    %c2_37 = arith.constant 2 : index
    %c0_38 = arith.constant 0 : index
    %c0_39 = arith.constant 0 : index
    %66 = vector.load %arg3[%c2_37, %c0_38, %c0_39] : memref<4x128x128xbf16, #tpu.memory_space<vmem>>, vector<1x128x128xbf16>
    %67 = vector.shape_cast %66 : vector<1x128x128xbf16> to vector<128x128xbf16>
    %cst_40 = arith.constant dense<0.000000e+00> : vector<16x128xf32>
    %68 = tpu.matmul %65, %67, %cst_40 {dimension_numbers = #tpu.dot_dimension_numbers<[1], [0], [0], [1], [0, 0, 1, 1], [], []>} : vector<16x128xbf16>, vector<128x128xbf16>, vector<16x128xf32> -> vector<16x128xf32>
    %c16_i32_41 = arith.constant 16 : i32
    %69 = vector.broadcast %c16_i32_41 : i32 to vector<16x1xi32>
    %70 = arith.cmpi eq, %60, %69 : vector<16x1xi32>
    %c2_42 = arith.constant 2 : index
    %c0_43 = arith.constant 0 : index
    %71 = vector.load %arg4[%c2_42, %c0_43] : memref<4x128xf32, #tpu.memory_space<vmem>>, vector<1x128xf32>
    %cst_44 = arith.constant 0.000000e+00 : f32
    %72 = vector.shape_cast %70 : vector<16x1xi1> to vector<16x1xi1>
    %73 = vector.broadcast %72 : vector<16x1xi1> to vector<16x128xi1>
    %74 = vector.shape_cast %71 : vector<1x128xf32> to vector<1x128xf32>
    %75 = vector.broadcast %74 : vector<1x128xf32> to vector<16x128xf32>
    %76 = vector.broadcast %cst_44 : f32 to vector<16x128xf32>
    %77 = arith.select %73, %75, %76 : vector<16x128xi1>, vector<16x128xf32>
    %78 = arith.addf %68, %77 : vector<16x128xf32>
    %c0_45 = arith.constant 0 : index
    %c0_46 = arith.constant 0 : index
    %c0_47 = arith.constant 0 : index
    %79 = vector.load %arg6[%c0_45, %c0_46, %c0_47] : memref<1x16x128xf32, #tpu.memory_space<vmem>>, vector<1x16x128xf32>
    %80 = vector.shape_cast %79 : vector<1x16x128xf32> to vector<16x128xf32>
    %81 = arith.addf %80, %78 : vector<16x128xf32>
    %c0_48 = arith.constant 0 : index
    %c0_49 = arith.constant 0 : index
    %c0_50 = arith.constant 0 : index
    %82 = vector.load %arg6[%c0_48, %c0_49, %c0_50] : memref<1x16x128xf32, #tpu.memory_space<vmem>>, vector<1x16x128xf32>
    %83 = vector.shape_cast %82 : vector<1x16x128xf32> to vector<16x128xf32>
    %84 = vector.shape_cast %81 : vector<16x128xf32> to vector<1x16x128xf32>
    tpu.vector_store %arg6[%c0_48, %c0_49, %c0_50], %84 {strides = array<i32>} : memref<1x16x128xf32, #tpu.memory_space<vmem>>, vector<1x16x128xf32>,
    %c0_51 = arith.constant 0 : index
    %c0_52 = arith.constant 0 : index
    %c3 = arith.constant 3 : index
    %85 = vector.load %arg2[%c0_51, %c0_52, %c3] : memref<1x16x4xi32, #tpu.memory_space<vmem>>, vector<1x16x1xi32>
    %86 = vector.shape_cast %85 : vector<1x16x1xi32> to vector<16x1xi32>
    %87 = vector.broadcast %86 : vector<16x1xi32> to vector<16x128xi32>
    %88 = arith.cmpi eq, %87, %0 : vector<16x128xi32>
    %89 = arith.extui %88 : vector<16x128xi1> to vector<16x128xi32>
    %90 = arith.sitofp %89 : vector<16x128xi32> to vector<16x128xf32>
    %91 = arith.truncf %90 : vector<16x128xf32> to vector<16x128xbf16>
    %c3_53 = arith.constant 3 : index
    %c0_54 = arith.constant 0 : index
    %c0_55 = arith.constant 0 : index
    %92 = vector.load %arg3[%c3_53, %c0_54, %c0_55] : memref<4x128x128xbf16, #tpu.memory_space<vmem>>, vector<1x128x128xbf16>
    %93 = vector.shape_cast %92 : vector<1x128x128xbf16> to vector<128x128xbf16>
    %cst_56 = arith.constant dense<0.000000e+00> : vector<16x128xf32>
    %94 = tpu.matmul %91, %93, %cst_56 {dimension_numbers = #tpu.dot_dimension_numbers<[1], [0], [0], [1], [0, 0, 1, 1], [], []>} : vector<16x128xbf16>, vector<128x128xbf16>, vector<16x128xf32> -> vector<16x128xf32>
    %c16_i32_57 = arith.constant 16 : i32
    %95 = vector.broadcast %c16_i32_57 : i32 to vector<16x1xi32>
    %96 = arith.cmpi eq, %86, %95 : vector<16x1xi32>
    %c3_58 = arith.constant 3 : index
    %c0_59 = arith.constant 0 : index
    %97 = vector.load %arg4[%c3_58, %c0_59] : memref<4x128xf32, #tpu.memory_space<vmem>>, vector<1x128xf32>
    %cst_60 = arith.constant 0.000000e+00 : f32
    %98 = vector.shape_cast %96 : vector<16x1xi1> to vector<16x1xi1>
    %99 = vector.broadcast %98 : vector<16x1xi1> to vector<16x128xi1>
    %100 = vector.shape_cast %97 : vector<1x128xf32> to vector<1x128xf32>
    %101 = vector.broadcast %100 : vector<1x128xf32> to vector<16x128xf32>
    %102 = vector.broadcast %cst_60 : f32 to vector<16x128xf32>
    %103 = arith.select %99, %101, %102 : vector<16x128xi1>, vector<16x128xf32>
    %104 = arith.addf %94, %103 : vector<16x128xf32>
    %c0_61 = arith.constant 0 : index
    %c0_62 = arith.constant 0 : index
    %c0_63 = arith.constant 0 : index
    %105 = vector.load %arg6[%c0_61, %c0_62, %c0_63] : memref<1x16x128xf32, #tpu.memory_space<vmem>>, vector<1x16x128xf32>
    %106 = vector.shape_cast %105 : vector<1x16x128xf32> to vector<16x128xf32>
    %107 = arith.addf %106, %104 : vector<16x128xf32>
    %c0_64 = arith.constant 0 : index
    %c0_65 = arith.constant 0 : index
    %c0_66 = arith.constant 0 : index
    %108 = vector.load %arg6[%c0_64, %c0_65, %c0_66] : memref<1x16x128xf32, #tpu.memory_space<vmem>>, vector<1x16x128xf32>
    %109 = vector.shape_cast %108 : vector<1x16x128xf32> to vector<16x128xf32>
    %110 = vector.shape_cast %107 : vector<16x128xf32> to vector<1x16x128xf32>
    tpu.vector_store %arg6[%c0_64, %c0_65, %c0_66], %110 {strides = array<i32>} : memref<1x16x128xf32, #tpu.memory_space<vmem>>, vector<1x16x128xf32>,
    return
  }
  func.func @transform_0(%arg0: i32, %arg1: i32) -> (i32, i32, i32) {
    %c0_i32 = arith.constant 0 : i32
    %c0_i32_0 = arith.constant 0 : i32
    return %arg0, %arg1, %c0_i32 : i32, i32, i32
  }
  func.func @transform_1(%arg0: i32, %arg1: i32) -> (i32, i32, i32) {
    %c0_i32 = arith.constant 0 : i32
    %c0_i32_0 = arith.constant 0 : i32
    %c0_i32_1 = arith.constant 0 : i32
    %c0_i32_2 = arith.constant 0 : i32
    return %c0_i32, %c0_i32_0, %c0_i32_1 : i32, i32, i32
  }
  func.func @transform_2(%arg0: i32, %arg1: i32) -> (i32, i32) {
    %c0_i32 = arith.constant 0 : i32
    %c0_i32_0 = arith.constant 0 : i32
    %c0_i32_1 = arith.constant 0 : i32
    return %c0_i32, %c0_i32_0 : i32, i32
  }
  func.func @transform_3(%arg0: i32, %arg1: i32) -> (i32, i32) {
    %c0_i32 = arith.constant 0 : i32
    %c0_i32_0 = arith.constant 0 : i32
    %c0_i32_1 = arith.constant 0 : i32
    return %c0_i32, %c0_i32_0 : i32, i32
  }
  func.func @transform_4(%arg0: i32, %arg1: i32) -> (i32, i32, i32) {
    %c0_i32 = arith.constant 0 : i32
    %c0_i32_0 = arith.constant 0 : i32
    return %arg0, %arg1, %c0_i32 : i32, i32, i32
  }
}

</mosaic_0001>

<bundles_post_ra>
// kernel: tpu_custom_call.1
= control target key start
LH: loop header
LB: loop body
LE: loop exit
PB: predicated region body
PF: predicated region fallthrough
CT: control target
= control target key end

     0   :  { %9 = vsyncpa [#allocation3], 0  ;;  %s1685_s0 = inlined_call_operand.vmem [shape: s32[2,16,4], index: 0, kind: input, shape index: {}]   ;;  %s1686_s1 = inlined_call_operand.hbm [shape: bf16[4,128,128], index: 1, kind: input, shape index: {}]   ;;  %s1687_s2 = inlined_call_operand.vmem [shape: f32[4,128], index: 2, kind: input, shape index: {}]   ;;  %s1688_s3 = inlined_call_operand.vmem [shape: f32[1,128], index: 3, kind: input, shape index: {}]   ;;  %s1689_s4 = inlined_call_operand.hbm [shape: f32[2,16,128], index: 4, kind: output, shape index: {}]  }
   0x1   :  { %10 = vsyncpa [#allocation4], 0 }
   0x2   :  { %12 = vsyncpa [#allocation4 + $0x1], 0  ;;  %s1442_s15 = smov 0   ;;  %s1444_s16 = smov 0  }
   0x3   :  { %s1446_s17 = smov 0   ;;  %s1448_s18 = smov 0  }
   0x4   :  { %s1450_s19 = smov 0   ;;  %s1452_s20 = smov 0  }
   0x5 LB: > { %s944_s21 = sadd.s32 4294967295, %s1402_s20   ;;  %s945_s22 = sadd.s32 4294967294, %s1402_s20   ;;  %s1402_s20 = sphi %s1452_s20, %s18_s20   ;;  %s1398_s19 = sphi %s1450_s19, %s1707_s19   ;;  %s1394_s18 = sphi %s1448_s18, %s1706_s18   ;;  %s1390_s17 = sphi %s1446_s17, %s1705_s17   ;;  %s1386_s16 = sphi %s1444_s16, %s1704_s16   ;;  %s1382_s15 = sphi %s1442_s15, %s1703_s15  }
   0x6   : > { %s30_s23 = sadd.s32 1, %s1398_s19  ;;  %s130_s24 = sadd.s32 1, %s1390_s17 }
   0x7   : > { %p32_p0 = scmp.ge.s32.totalorder %s30_s23, 2  ;;  %p140_p1 = scmp.ne.s32.totalorder %s1390_s17, %s1386_s16 }
   0x8   : > { %p141_p2 = scmp.eq.s32.totalorder %s944_s21, 1  ;;  %p146_p3 = scmp.ne.s32.totalorder %s1386_s16, %s1382_s15 }
   0x9   : > { %s1709_s23 = smov (%p32_p0, %s30_s23), 0  ;;  %p147_p5 = scmp.eq.s32.totalorder %s945_s22, 1 }
   0xa   : > { %p1482_p4 = por %p141_p2, %p140_p1  ;;  %s125_s26 = ssub.s32 %s1398_s19, %s1709_s23 }
   0xb   : > { %p946_p6 = scmp.ge.s32.totalorder %s1402_s20, 1  ;;  %p128_p7 = scmp.eq.s32.totalorder %s125_s26, 0 }
   0xc   : > { %s1694_s25 = scalar_select %p1482_p4, 1, 0 }
   0xd   : > { %p1489_p8 = por %p147_p5, %p146_p3  ;;  %p154_p9 = scmp.lt.s32.totalorder %s1402_s20, 3 }
   0xe   : > { %s1495_s28 = scalar_select %p128_p7, %s1390_s17, %s130_s24  }
   0xf   : > { %s1695_s27 = scalar_select %p1489_p8, 1, 0 }
  0x10   : > { %p1497_p10 = pnand %p946_p6, %p154_p9  ;;  %p1501_p11 = scmp.eq.s32.totalorder %s944_s21, 0 }
  0x11   : > { %s1404_s5 = smov [#allocation2]   ;;  %s1292_s10 = scalar_lea.hbm %s1686_s1, 4096 }
  0x12   : > { %s1696_s29 = scalar_select %p1497_p10, 1, 0 }
  0x13   : > { %s1697_s30 = scalar_select %p1501_p11, 1, 0 }
  0x14   : > { %p1176_p12 = pneg %p1497_p10  ;;  %s166_s6 = sshll.u32 %s1404_s5, 4  ;;  %s167_s6 = int_to_ptr.vmem [resolvable:$true] %s166_s6 }
  0x15   : > { %p1293_p0 = scmp.ne.s32.totalorder %s1686_s1, %s1292_s10  ;;  %p1299_p5 = scmp.lt.u32.totalorder %s1292_s10, %s1686_s1 }
  0x16   : > { %p1509_p13 = pnand %p1501_p11, %p1176_p12 }
  0x18   : > { %p1294_p1 = pneg %p1509_p13 }
  0x1a   : > { %p1295_p2 = pnand %p1294_p1, %p1293_p0 }
  0x1c   : > { %p1296_p3 = pneg %p1295_p2 }
  0x1e   : > { %p1301_p6 = pnand %p1299_p5, %p1296_p3 }
  0x20   : > { %1304 = shalt.err (!%p1301_p6)
}
  0x21   : > { %s1305_s21 = scalar_lea.vmem %s167_s6, 4096  ;;  %p1313_p8 = scmp.lt.s32.totalorder %s167_s6, %s167_s6 }
  0x22   : > { %p1306_p7 = scmp.ne.s32.totalorder %s167_s6, %s1305_s21  ;;  %p1314_p4 = scmp.lt.s32.totalorder %s1305_s21, %s1305_s21 }
  0x24   : > { %p1308_p9 = pnand %p1306_p7, %p1294_p1  ;;  %p1315_p11 = por %p1314_p4, %p1313_p8 }
  0x26   : > { %p1309_p12 = pneg %p1308_p9 }
  0x28   : > { %p1316_p10 = pnand %p1315_p11, %p1309_p12 }
  0x2a   : > { %1319 = shalt.err (!%p1316_p10)
}
  0x2b   : > { %s1405_s22 = smov 64   ;;  %s1406_s24 = smov 4  }
  0x2c   : > { %1179 = dma.hbm_to_vmem [thread:$0]  (!%p1509_p13), %s1686_s1, 4096, %s167_s6, [#allocation3], %s1405_s22, %s1405_s22, %s1406_s24  }
  0x2d   : > { %p1699_p0 = scmp.ne.s32.totalorder %s1696_s29, 0 }
  0x2e   : > { %p1700_p2 = scmp.ne.s32.totalorder (!%p1699_p0), %s1697_s30, 0 }
  0x2f   : > { %201 = sbr.rel (%p1699_p0) target bundleno = 466 (0x1d2), region = 36 }
  0x36   : > { %1373 = dma.done.wait (%p1700_p2), [#allocation3], 4096  }
  0x37   : > { %1375 = vsyncadd (%p1700_p2), [#allocation3], 4294963200  ;;  %p232_p4 = scmp.lt.s32.totalorder %s1394_s18, 1  ;;  %v1407_v0 = vmov 2   ;;  %v1408_v1 = vmov 0   ;;  %v1409_v2 = vmov 0.0   ;;  %v243_v25 = vlaneseq }
  0x38   : > { %1248 = vset.pattern.permute.xlu1 %v1407_v0  ;;  %1247 = vset.pattern.permute.xlu0 %v1408_v1  ;;  %v1260_v5 = vld [vmem:[#allocation2] sm:$0xff]   ;;  %v1262_v7 = vld [vmem:[#allocation2 + $0x8] sm:$0xff]   ;;  %v1264_v9 = vld [vmem:[#allocation2 + $0x10] sm:$0xff]   ;;  %vm1410_vm0 = vmmov 0   ;;  %v1411_v11 = vmov 1   ;;  %v1412_v14 = vmov 3  }
  0x39   : > { %s233_s7 = scalar_select %p232_p4, %s1394_s18, 1  ;;  %1050 = vmatprep.subr.bf16.mxu1 %v1409_v2  ;;  %1090 = vmatprep.subr.bf16.mxu0 %v1409_v2  ;;  %v1261_v6 = vld [vmem:[#allocation2 + $0x80] sm:$0xff]   ;;  %v1263_v8 = vld [vmem:[#allocation2 + $0x88] sm:$0xff]   ;;  %v1265_v10 = vld [vmem:[#allocation2 + $0x90] sm:$0xff]   ;;  %v1583_v28 = vand.u32 127, %v243_v25 }
  0x3a   : > { %1051 = vmatpush3.bf16.msra.mxu1 %v1260_v5  ;;  %1091 = vmatpush3.bf16.msra.mxu0 %v1261_v6  ;;  %v1266_v12 = vld [vmem:[#allocation2 + $0x18] sm:$0xff]   ;;  %v1268_v15 = vld [vmem:[#allocation2 + $0x20] sm:$0xff]   ;;  %v1270_v17 = vld [vmem:[#allocation2 + $0x28] sm:$0xff]   ;;  %v1413_v33 = vmov 1.0|1.0   ;;  %s228_s21 = sand.u32 1, %s1386_s16  }
  0x3b   : > { %s1012_s29 = sshll.u32 %s233_s7, 4  ;;  %1052 = vmatprep.subr.bf16.mxu1 %v1409_v2  ;;  %1092 = vmatprep.subr.bf16.mxu0 %v1409_v2  ;;  %v1267_v13 = vld [vmem:[#allocation2 + $0x98] sm:$0xff]   ;;  %v1269_v16 = vld [vmem:[#allocation2 + $0xa0] sm:$0xff]   ;;  %v1271_v18 = vld [vmem:[#allocation2 + $0xa8] sm:$0xff]   ;;  %s951_s22 = sshll.u32 %s228_s21, 4 }
  0x3c   : > { %s239_s30 = scalar_lea.vmem %s1685_s0, %s1012_s29  ;;  %1066 = vmatprep.mubr.msk.bf16.mxu1 %vm1410_vm0, %v1409_v2  ;;  %1106 = vmatprep.mubr.msk.bf16.mxu0 %vm1410_vm0, %v1409_v2  ;;  %v1272_v19 = vld [vmem:[#allocation2 + $0x30] sm:$0xff]   ;;  %v1274_v21 = vld [vmem:[#allocation2 + $0x38] sm:$0xff]   ;;  %v1277_v31 = vld [vmem:[#allocation2 + $0xc0] sm:$0xff]   ;;  %s1013_s29 = sshll.u32 %s1394_s18, 8 }
  0x3d   : > { %v1544_v3 = vld [vmem:[%s239_s30] sm:$0xff]  ;;  %v1546_v4 = vld [vmem:[%s239_s30 + $0x8] sm:$0xff]  ;;  %v1273_v20 = vld [vmem:[#allocation2 + $0xb0] sm:$0xff]   ;;  %s230_s6 = scalar_lea.vmem [#allocation5], %s951_s22  ;;  %s1633_s10 = scalar_lea.hbm %s1689_s4, %s1013_s29 }
  0x3e   : > { %548 = vperm.xlu1 %1248, %v1544_v3   ;;  %257 = vperm.xlu0 %1247, %v1544_v3   ;;  %v1275_v22 = vld [vmem:[#allocation2 + $0xb8] sm:$0xff]   ;;  %vm577_vm1 = vcmp.eq.s32.totalorder %v1544_v3, 16  ;;  %vm286_vm2 = vcmp.eq.s32.totalorder %v1546_v4, 16  ;;  %v1276_v32 = vld [vmem:[#allocation2 + $0x40] sm:$0xff]   ;;  %v1279_v34 = vld [vmem:[#allocation2 + $0xc8] sm:$0xff]   ;;  %s853_s8 = sshll.u32 %s230_s6, 4  ;;  %s1635_s8 = int_to_ptr.vmem [resolvable:$true] %s853_s8 }
  0x3f   : > { %1053 = vmatpush3.bf16.msra.mxu1 %v1262_v7  ;;  %1093 = vmatpush3.bf16.msra.mxu0 %v1263_v8  ;;  %v288_v23 = vsel %vm577_vm1, 1, %v1408_v1  ;;  %v289_v24 = vsel %vm286_vm2, 1, %v1408_v1  ;;  %v1278_v35 = vld [vmem:[#allocation2 + $0x48] sm:$0xff]   ;;  %v1281_v36 = vld [vmem:[#allocation2 + $0xd0] sm:$0xff]   ;;  %v1283_v38 = vld [vmem:[#allocation2 + $0xd8] sm:$0xff]   ;;  %s1639_s18 = scalar_lea.sflag [#allocation4], %s228_s21 }
  0x40   : > { %1054 = vmatprep.subr.bf16.mxu1 %v1409_v2  ;;  %1094 = vmatprep.subr.bf16.mxu0 %v1409_v2  ;;  %v1280_v37 = vld [vmem:[#allocation2 + $0x50] sm:$0xff]   ;;  %v1282_v39 = vld [vmem:[#allocation2 + $0x58] sm:$0xff]   ;;  %v1285_v40 = vld [vmem:[#allocation2 + $0xe0] sm:$0xff]   ;;  %s1320_s11 = scalar_lea.vmem %s1635_s8, 256  ;;  %p1701_p10 = scmp.ne.s32.totalorder %s1694_s25, 0 }
  0x41   : > { %v1284_v41 = vld [vmem:[#allocation2 + $0x60] sm:$0xff]   ;;  %v1287_v42 = vld [vmem:[#allocation2 + $0xe8] sm:$0xff]   ;;  %v1288_v46 = vld [vmem:[#allocation2 + $0xf0] sm:$0xff]   ;;  %p1321_p8 = scmp.ne.s32.totalorder %s1635_s8, %s1320_s11  ;;  %s1414_s12 = smov [#allocation5]  }
  0x42   : > { %551 = vperm.xlu1 %1248, %v1546_v4   ;;  %260 = vperm.xlu0 %1247, %v1546_v4   ;;  %v1286_v45 = vld [vmem:[#allocation2 + $0x68] sm:$0xff]   ;;  %v1289_v47 = vld [vmem:[#allocation2 + $0x70] sm:$0xff]   ;;  %v1290_v50 = vld [vmem:[#allocation2 + $0xf8] sm:$0xff]   ;;  %s1324_s13 = sshll.u32 %s1414_s12, 4  ;;  %s1325_s13 = int_to_ptr.vmem [resolvable:$false] %s1324_s13 }
  0x43   : > { %1055 = vmatpush3.bf16.msra.mxu1 %v1264_v9  ;;  %1095 = vmatpush3.bf16.msra.mxu0 %v1265_v10  ;;  %v1291_v51 = vld [vmem:[#allocation2 + $0x78] sm:$0xff]   ;;  %v957_v56 = vld [vmem:[%s1687_s2] ss:$0 sm:$0xff]  ;;  %v970_v60 = vld [vmem:[%s1687_s2 + $0x1] ss:$0 sm:$0xff]  ;;  %p1322_p11 = pnand %p1321_p8, %p1701_p10  ;;  %s1326_s14 = scalar_lea.vmem %s1325_s13, 512 }
  0x44   : > { %1056 = vmatprep.subr.bf16.mxu1 %v1409_v2  ;;  %1096 = vmatprep.subr.bf16.mxu0 %v1409_v2  ;;  %v954_v58 = vld [vmem:[%s1688_s3] ss:$0 sm:$0xff]  ;;  %v983_v6 = vld [vmem:[%s1687_s2 + $0x2] ss:$0 sm:$0xff]  ;;  %p1327_p1 = scmp.lt.s32.totalorder %s1635_s8, %s1325_s13  ;;  %p1328_p3 = scmp.lt.s32.totalorder %s1326_s14, %s1320_s11 }
  0x45   : > { %p1323_p13 = pneg %p1322_p11 }
  0x46   : > { %1250 = vset.pattern.permute.xlu1 %v1411_v11  ;;  %1249 = vset.pattern.permute.xlu0 %v1411_v11  ;;  %p1329_p5 = por %p1328_p3, %p1327_p1 }
  0x47   : > { %405 = vperm.xlu1 %1250, %v1546_v4   ;;  %402 = vperm.xlu0 %1249, %v1544_v3  }
  0x48   : > { %1057 = vmatpush3.bf16.msra.mxu1 %v1266_v12  ;;  %1097 = vmatpush3.bf16.msra.mxu0 %v1267_v13  ;;  %p1330_p6 = pnand %p1329_p5, %p1323_p13 }
  0x49   : > { %1058 = vmatprep.subr.bf16.mxu1 %v1409_v2  ;;  %1098 = vmatprep.subr.bf16.mxu0 %v1409_v2 }
  0x4b   : > { %1251 = vset.pattern.permute.xlu1 %v1412_v14  ;;  %1252 = vset.pattern.permute.xlu0 %v1412_v14 }
  0x4c   : > { %694 = vperm.xlu1 %1251, %v1544_v3   ;;  %697 = vperm.xlu0 %1252, %v1546_v4  }
  0x4d   : > { %1059 = vmatpush3.bf16.msra.mxu1 %v1268_v15  ;;  %1099 = vmatpush3.bf16.msra.mxu0 %v1269_v16 }
  0x4e   : > { %1060 = vmatprep.subr.bf16.mxu1 %v1409_v2  ;;  %1100 = vmatprep.subr.bf16.mxu0 %v1409_v2 }
  0x50   : > { %1253 = vset.pattern.permute.xlu1 %v1408_v1  ;;  %1254 = vset.pattern.permute.xlu0 %v1411_v11 }
  0x51   : > { %1061 = vmatpush3.bf16.msra.mxu1 %v1270_v17  ;;  %1101 = vmatpush3.bf16.msra.mxu0 %v1271_v18 }
  0x52   : > { %1062 = vmatprep.subr.bf16.mxu1 %v1409_v2  ;;  %1102 = vmatprep.subr.bf16.mxu0 %v1409_v2 }
  0x53   : > { %291 = vperm.xlu1 %1253, %v288_v23   ;;  %437 = vperm.xlu0 %1254, %v288_v23  }
  0x55   : > { %1063 = vmatpush3.bf16.msra.mxu1 %v1272_v19  ;;  %1103 = vmatpush3.bf16.msra.mxu0 %v1273_v20 }
  0x56   : > { %1064 = vmatprep.subr.bf16.mxu1 %v1409_v2  ;;  %1104 = vmatprep.subr.bf16.mxu0 %v1409_v2 }
  0x57   : > { %294 = vperm.xlu1 %1253, %v289_v24   ;;  %1257 = vset.pattern.permute.xlu0 %v1407_v0 }
  0x58   : > { %586 = vperm.xlu0 %1257, %v289_v24  }
  0x59   : > { %1065 = vmatpush3.bf16.msra.mxu1 %v1274_v21  ;;  %1105 = vmatpush3.bf16.msra.mxu0 %v1275_v22 }
  0x5a   : > { %1070 = vmatprep.subr.bf16.mxu1 %v1409_v2  ;;  %1110 = vmatprep.subr.bf16.mxu0 %v1409_v2 }
  0x5b   : > { %1255 = vset.pattern.permute.xlu1 %v1411_v11 }
  0x5c   : > { %440 = vperm.xlu1 %1255, %v289_v24   ;;  %1259 = vset.pattern.permute.xlu0 %v1412_v14 }
  0x60   : > { %1256 = vset.pattern.permute.xlu1 %v1407_v0 }
  0x61   : > { %583 = vperm.xlu1 %1256, %v288_v23  }
  0x65   : > { %1258 = vset.pattern.permute.xlu1 %v1412_v14  ;;  %v996_v14 = vld [vmem:[%s1687_s2 + $0x3] ss:$0 sm:$0xff] }
  0x66   : > { %729 = vperm.xlu1 %1258, %v288_v23  }
  0x6a   : > { %732 = vperm.xlu1 %1258, %v289_v24  }
  0xbd   : > { %v549_v26 = vpop.permute.xlu1 %548  ;;  %v258_v27 = vpop.permute.xlu0 %257 }
  0xbe   : > { %vm553_vm3 = vcmp.eq.s32.totalorder %v549_v26, %v1583_v28  ;;  %vm262_vm6 = vcmp.eq.s32.totalorder %v258_v27, %v1583_v28 }
  0xc1   : > { %v552_v29 = vpop.permute.xlu1 %551  ;;  %v261_v30 = vpop.permute.xlu0 %260 }
  0xc2   : > { %vm554_vm4 = vcmp.eq.s32.totalorder %v552_v29, %v1583_v28  ;;  %vm263_vm5 = vcmp.eq.s32.totalorder %v261_v30, %v1583_v28 }
  0xc3   : > { %vm992_vm7 = vmpackc.low %vm554_vm4, %vm553_vm3 }
  0xc4   : > { %vm966_vm8 = vmpackc.low %vm263_vm5, %vm262_vm6  ;;  %1107 = vmatmul.mubr.msk.bf16.vlgmr.msra.gmra.mrb[0].mxu0 %vm992_vm7, %v1413_v33 }
  0xc5   : > { %1067 = vmatmul.mubr.msk.bf16.vlgmr.msra.gmra.mrb[0].mxu1 %vm966_vm8, %v1413_v33  ;;  %1111 = vmatpush3.bf16.msra.mxu0 %v1277_v31 }
  0xc6   : > { %1071 = vmatpush3.bf16.msra.mxu1 %v1276_v32  ;;  %1112 = vmatprep.subr.bf16.mxu0 %v1409_v2  ;;  %v406_v43 = vpop.permute.xlu1 %405  ;;  %v403_v44 = vpop.permute.xlu0 %402 }
  0xc7   : > { %1072 = vmatprep.subr.bf16.mxu1 %v1409_v2  ;;  %1086 = vmatprep.mubr.msk.bf16.mxu1 %vm1410_vm0, %v1409_v2  ;;  %vm408_vm11 = vcmp.eq.s32.totalorder %v406_v43, %v1583_v28  ;;  %vm407_vm12 = vcmp.eq.s32.totalorder %v403_v44, %v1583_v28 }
  0xc8   : > { %1126 = vmatprep.mubr.msk.bf16.mxu0 %vm1410_vm0, %v1409_v2  ;;  %vm979_vm14 = vmpackc.low %vm408_vm11, %vm407_vm12 }
  0xc9   : > { %1113 = vmatpush3.bf16.msra.mxu0 %v1279_v34 }
  0xca   : > { %1073 = vmatpush3.bf16.msra.mxu1 %v1278_v35  ;;  %1114 = vmatprep.subr.bf16.mxu0 %v1409_v2 }
  0xcb   : > { %1074 = vmatprep.subr.bf16.mxu1 %v1409_v2  ;;  %v695_v48 = vpop.permute.xlu1 %694  ;;  %v698_v49 = vpop.permute.xlu0 %697 }
  0xcc   : > { %vm699_vm9 = vcmp.eq.s32.totalorder %v695_v48, %v1583_v28  ;;  %vm700_vm10 = vcmp.eq.s32.totalorder %v698_v49, %v1583_v28 }
  0xcd   : > { %1115 = vmatpush3.bf16.msra.mxu0 %v1281_v36  ;;  %vm1005_vm13 = vmpackc.low %vm700_vm10, %vm699_vm9 }
  0xce   : > { %1075 = vmatpush3.bf16.msra.mxu1 %v1280_v37  ;;  %1116 = vmatprep.subr.bf16.mxu0 %v1409_v2 }
  0xcf   : > { %1076 = vmatprep.subr.bf16.mxu1 %v1409_v2 }
  0xd1   : > { %1117 = vmatpush3.bf16.msra.mxu0 %v1283_v38 }
  0xd2   : > { %1077 = vmatpush3.bf16.msra.mxu1 %v1282_v39  ;;  %1118 = vmatprep.subr.bf16.mxu0 %v1409_v2  ;;  %v292_v52 = vpop.permute.xlu1 %291  ;;  %v438_v57 = vpop.permute.xlu0 %437 }
  0xd3   : > { %1078 = vmatprep.subr.bf16.mxu1 %v1409_v2  ;;  %vm296_vm15 = vcmp.eq.s32.totalorder %v292_v52, 1  ;;  %vm442_vm1 = vcmp.eq.s32.totalorder %v438_v57, 1 }
  0xd4   : > { %v302_v59 = vsel %vm296_vm15, %v957_v56, 0.0  ;;  %v448_v0 = vsel %vm442_vm1, %v970_v60, 0.0 }
  0xd5   : > { %1119 = vmatpush3.bf16.msra.mxu0 %v1285_v40  ;;  %v1130_v63 = vadd.f32 %v954_v58, %v302_v59 }
  0xd6   : > { %1079 = vmatpush3.bf16.msra.mxu1 %v1284_v41  ;;  %1120 = vmatprep.subr.bf16.mxu0 %v1409_v2  ;;  %v295_v53 = vpop.permute.xlu1 %294 }
  0xd7   : > { %1080 = vmatprep.subr.bf16.mxu1 %v1409_v2  ;;  %vm297_vm0 = vcmp.eq.s32.totalorder %v295_v53, 1  ;;  %v587_v1 = vpop.permute.xlu0 %586  ;;  %v1133_v4 = vadd.f32 %v1130_v63, %v448_v0 }
  0xd8   : > { %v303_v62 = vsel %vm297_vm0, %v957_v56, 0.0  ;;  %vm589_vm4 = vcmp.eq.s32.totalorder %v587_v1, 1 }
  0xd9   : > { %1121 = vmatpush3.bf16.msra.mxu0 %v1287_v42  ;;  %v595_v18 = vsel %vm589_vm4, %v983_v6, 0.0 }
  0xda   : > { %1081 = vmatpush3.bf16.msra.mxu1 %v1286_v45  ;;  %1122 = vmatprep.subr.bf16.mxu0 %v1409_v2 }
  0xdb   : > { %1082 = vmatprep.subr.bf16.mxu1 %v1409_v2  ;;  %v441_v54 = vpop.permute.xlu1 %440 }
  0xdc   : > { %vm443_vm2 = vcmp.eq.s32.totalorder %v441_v54, 1 }
  0xdd   : > { %1123 = vmatpush3.bf16.msra.mxu0 %v1288_v46  ;;  %v449_v3 = vsel %vm443_vm2, %v970_v60, 0.0 }
  0xde   : > { %1083 = vmatpush3.bf16.msra.mxu1 %v1289_v47  ;;  %1124 = vmatprep.subr.bf16.mxu0 %v1409_v2 }
  0xdf   : > { %1084 = vmatprep.subr.bf16.mxu1 %v1409_v2  ;;  %v1146_v2 = vadd.f32 %v954_v58, %v303_v62 }
  0xe0   : > { %v584_v55 = vpop.permute.xlu1 %583 }
  0xe1   : > { %1125 = vmatpush3.bf16.msra.mxu0 %v1290_v50  ;;  %vm588_vm3 = vcmp.eq.s32.totalorder %v584_v55, 1  ;;  %v1149_v10 = vadd.f32 %v1146_v2, %v449_v3 }
  0xe2   : > { %1085 = vmatpush3.bf16.msra.mxu1 %v1291_v51  ;;  %v594_v17 = vsel %vm588_vm3, %v983_v6, 0.0 }
  0xe4   : > { %1127 = vmatmul.mubr.msk.bf16.vlgmr.msra.gmra.mrb[0].mxu0 %vm1005_vm13, %v1413_v33 }
  0xe5   : > { %1087 = vmatmul.mubr.msk.bf16.vlgmr.msra.gmra.mrb[0].mxu1 %vm979_vm14, %v1413_v33  ;;  %v730_v61 = vpop.permute.xlu1 %729 }
  0xe6   : > { %vm734_vm5 = vcmp.eq.s32.totalorder %v730_v61, 1 }
  0xe7   : > { %v740_v22 = vsel %vm734_vm5, %v996_v14, 0.0 }
  0xe9   : > { %v733_v7 = vpop.permute.xlu1 %732 }
  0xea   : > { %vm735_vm6 = vcmp.eq.s32.totalorder %v733_v7, 1 }
  0xeb   : > { %v741_v25 = vsel %vm735_vm6, %v996_v14, 0.0 }
 0x1b7   : > { %v824_v5 = vpop.f32.mrb[0].mxu0 }
 0x1b8   : > { %v532_v8 = vpop.f32.mrb[0].mxu1  ;;  %v1128_v9 = vpop.f32.mrb[1].mxu0 }
 0x1b9   : > { %v1136_v11 = vadd.f32 %v1133_v4, %v532_v8  ;;  %v1088_v12 = vpop.f32.mrb[1].mxu1  ;;  %v827_v13 = vpop.f32.mrb[2].mxu0 }
 0x1ba   : > { %v535_v15 = vpop.f32.mrb[2].mxu1  ;;  %v1129_v16 = vpop.f32.mrb[3].mxu0 }
 0x1bb   : > { %v1152_v19 = vadd.f32 %v1149_v10, %v535_v15  ;;  %v1089_v20 = vpop.f32.mrb[3].mxu1  ;;  %v1139_v21 = vadd.f32 %v1136_v11, %v594_v17 }
 0x1bd   : > { %v1155_v23 = vadd.f32 %v1152_v19, %v595_v18  ;;  %v1142_v24 = vadd.f32 %v1139_v21, %v740_v22 }
 0x1bf   : > { %v1158_v26 = vadd.f32 %v1155_v23, %v741_v25  ;;  %v1145_v27 = vadd.f32 %v1142_v24, %v824_v5 }
 0x1c1   : > { %v1161_v28 = vadd.f32 %v1158_v26, %v827_v13  ;;  %835 = vst [vmem:[%s230_s6] sm:$0xff] %v1145_v27 }
 0x1c3   : > { %836 = vst [vmem:[%s230_s6 + $0x8] sm:$0xff] %v1161_v28 }
 0x1c4   : > { %1333 = shalt.err (!%p1330_p6)
}
 0x1c5   : > { %s1334_s21 = scalar_lea.hbm %s1633_s10, 256  ;;  %s1338_s26 = scalar_lea.hbm %s1689_s4, 512 }
 0x1c6   : > { %p1335_p7 = scmp.ne.s32.totalorder %s1633_s10, %s1334_s21  ;;  %p1339_p0 = scmp.lt.u32.totalorder %s1633_s10, %s1689_s4 }
 0x1c7   : > { %p1340_p2 = scmp.lt.u32.totalorder %s1338_s26, %s1334_s21  ;;  %p1342_p8 = scmp.lt.u32.totalorder %s1334_s21, %s1633_s10 }
 0x1c8   : > { %p1336_p9 = pnand %p1335_p7, %p1701_p10 }
 0x1c9   : > { %p1341_p4 = por %p1340_p2, %p1339_p0 }
 0x1ca   : > { %p1337_p12 = pneg %p1336_p9 }
 0x1cb   : > { %p1343_p11 = por %p1342_p8, %p1341_p4 }
 0x1cd   : > { %p1344_p13 = pnand %p1343_p11, %p1337_p12 }
 0x1cf   : > { %1347 = shalt.err (!%p1344_p13)
}
 0x1d0   : > { %s1415_s29 = smov 128   ;;  %s1416_s6 = smov 8  }
 0x1d1   : > { %1174 = dma.vmem_to_hbm [thread:$0]  (%p1701_p10), %s1635_s8, 256, %s1633_s10, %s1639_s18, %s1415_s29, %s1415_s29, %s1416_s6  }
 0x1d2 PF: > { %p1186_p1 = scmp.ge.s32.totalorder %s1402_s20, 2  ;;  %s868_s30 = sand.u32 1, %s1382_s15  }
 0x1d3   : > { %p1702_p3 = scmp.ne.s32.totalorder %s1695_s27, 0  ;;  %s869_s9 = scalar_lea.sflag [#allocation4], %s868_s30 }
 0x1d5   : > { %p1181_p5 = pnand %p1186_p1, %p1702_p3 }
 0x1d7   : > { %1377 = dma.done.wait (!%p1181_p5), %s869_s9, 256  }
 0x1d8   : > { %1379 = vsyncadd (!%p1181_p5), %s869_s9, 4294967040  ;;  %s18_s20 = sadd.s32 1, %s1402_s20   ;;  %s1703_s15 = smov %s1386_s16 }
 0x1d9   : > { %p15_p6 = scmp.ge.s32.totalorder %s18_s20, 4   ;;  %s1704_s16 = smov %s1390_s17 }
 0x1da   : > { %s1705_s17 = smov %s1495_s28  ;;  %s1706_s18 = smov %s1398_s19 }
 0x1db   : > { %s1707_s19 = smov %s1709_s23  ;;  %17 = sbr.rel (!%p15_p6) target bundleno = 5 (0x5), region = 79 }
 0x1e2   :  { %874 = vsyncpa [#allocation3], 1 }
 0x1e3   :  { %876 = vsyncpa [#allocation3 + $0x1], 1 }
 0x1e4   :  { %877 = vsyncpa [#allocation4], 1 }
 0x1e5   :  { %879 = vsyncpa [#allocation4 + $0x1], 1 }

// kernel: tpu_custom_call.1
= control target key start
LH: loop header
LB: loop body
LE: loop exit
PB: predicated region body
PF: predicated region fallthrough
CT: control target
= control target key end

     0   :  { %9 = vsyncpa [#allocation3], 0  ;;  %s1685_s0 = inlined_call_operand.vmem [shape: s32[2,16,4], index: 0, kind: input, shape index: {}]   ;;  %s1686_s1 = inlined_call_operand.hbm [shape: bf16[4,128,128], index: 1, kind: input, shape index: {}]   ;;  %s1687_s2 = inlined_call_operand.vmem [shape: f32[4,128], index: 2, kind: input, shape index: {}]   ;;  %s1688_s3 = inlined_call_operand.vmem [shape: f32[1,128], index: 3, kind: input, shape index: {}]   ;;  %s1689_s4 = inlined_call_operand.hbm [shape: f32[2,16,128], index: 4, kind: output, shape index: {}]  }
   0x1   :  { %10 = vsyncpa [#allocation4], 0 }
   0x2   :  { %12 = vsyncpa [#allocation4 + $0x1], 0  ;;  %s1442_s15 = smov 0   ;;  %s1444_s16 = smov 0  }
   0x3   :  { %s1446_s17 = smov 0   ;;  %s1448_s18 = smov 0  }
   0x4   :  { %s1450_s19 = smov 0   ;;  %s1452_s20 = smov 0  }
   0x5 LB: > { %s944_s21 = sadd.s32 4294967295, %s1402_s20   ;;  %s945_s22 = sadd.s32 4294967294, %s1402_s20   ;;  %s1402_s20 = sphi %s1452_s20, %s18_s20   ;;  %s1398_s19 = sphi %s1450_s19, %s1707_s19   ;;  %s1394_s18 = sphi %s1448_s18, %s1706_s18   ;;  %s1390_s17 = sphi %s1446_s17, %s1705_s17   ;;  %s1386_s16 = sphi %s1444_s16, %s1704_s16   ;;  %s1382_s15 = sphi %s1442_s15, %s1703_s15  }
   0x6   : > { %s30_s23 = sadd.s32 1, %s1398_s19  ;;  %s130_s24 = sadd.s32 1, %s1390_s17 }
   0x7   : > { %p32_p0 = scmp.ge.s32.totalorder %s30_s23, 2  ;;  %p140_p1 = scmp.ne.s32.totalorder %s1390_s17, %s1386_s16 }
   0x8   : > { %p141_p2 = scmp.eq.s32.totalorder %s944_s21, 1  ;;  %p146_p3 = scmp.ne.s32.totalorder %s1386_s16, %s1382_s15 }
   0x9   : > { %s1709_s23 = smov (%p32_p0, %s30_s23), 0  ;;  %p147_p5 = scmp.eq.s32.totalorder %s945_s22, 1 }
   0xa   : > { %p1482_p4 = por %p141_p2, %p140_p1  ;;  %s125_s26 = ssub.s32 %s1398_s19, %s1709_s23 }
   0xb   : > { %p946_p6 = scmp.ge.s32.totalorder %s1402_s20, 1  ;;  %p128_p7 = scmp.eq.s32.totalorder %s125_s26, 0 }
   0xc   : > { %s1694_s25 = scalar_select %p1482_p4, 1, 0 }
   0xd   : > { %p1489_p8 = por %p147_p5, %p146_p3  ;;  %p154_p9 = scmp.lt.s32.totalorder %s1402_s20, 3 }
   0xe   : > { %s1495_s28 = scalar_select %p128_p7, %s1390_s17, %s130_s24  }
   0xf   : > { %s1695_s27 = scalar_select %p1489_p8, 1, 0 }
  0x10   : > { %p1497_p10 = pnand %p946_p6, %p154_p9  ;;  %p1501_p11 = scmp.eq.s32.totalorder %s944_s21, 0 }
  0x11   : > { %s1404_s5 = smov [#allocation2]   ;;  %s1292_s10 = scalar_lea.hbm %s1686_s1, 4096 }
  0x12   : > { %s1696_s29 = scalar_select %p1497_p10, 1, 0 }
  0x13   : > { %s1697_s30 = scalar_select %p1501_p11, 1, 0 }
  0x14   : > { %p1176_p12 = pneg %p1497_p10  ;;  %s166_s6 = sshll.u32 %s1404_s5, 4  ;;  %s167_s6 = int_to_ptr.vmem [resolvable:$true] %s166_s6 }
  0x15   : > { %p1293_p0 = scmp.ne.s32.totalorder %s1686_s1, %s1292_s10  ;;  %p1299_p5 = scmp.lt.u32.totalorder %s1292_s10, %s1686_s1 }
  0x16   : > { %p1509_p13 = pnand %p1501_p11, %p1176_p12 }
  0x18   : > { %p1294_p1 = pneg %p1509_p13 }
  0x1a   : > { %p1295_p2 = pnand %p1294_p1, %p1293_p0 }
  0x1c   : > { %p1296_p3 = pneg %p1295_p2 }
  0x1e   : > { %p1301_p6 = pnand %p1299_p5, %p1296_p3 }
  0x20   : > { %1304 = shalt.err (!%p1301_p6)
}
  0x21   : > { %s1305_s21 = scalar_lea.vmem %s167_s6, 4096  ;;  %p1313_p8 = scmp.lt.s32.totalorder %s167_s6, %s167_s6 }
  0x22   : > { %p1306_p7 = scmp.ne.s32.totalorder %s167_s6, %s1305_s21  ;;  %p1314_p4 = scmp.lt.s32.totalorder %s1305_s21, %s1305_s21 }
  0x24   : > { %p1308_p9 = pnand %p1306_p7, %p1294_p1  ;;  %p1315_p11 = por %p1314_p4, %p1313_p8 }
  0x26   : > { %p1309_p12 = pneg %p1308_p9 }
  0x28   : > { %p1316_p10 = pnand %p1315_p11, %p1309_p12 }
  0x2a   : > { %1319 = shalt.err (!%p1316_p10)
}
  0x2b   : > { %s1405_s22 = smov 64   ;;  %s1406_s24 = smov 4  }
  0x2c   : > { %1179 = dma.hbm_to_vmem [thread:$0]  (!%p1509_p13), %s1686_s1, 4096, %s167_s6, [#allocation3], %s1405_s22, %s1405_s22, %s1406_s24  }
  0x2d   : > { %p1699_p0 = scmp.ne.s32.totalorder %s1696_s29, 0 }
  0x2e   : > { %p1700_p2 = scmp.ne.s32.totalorder (!%p1699_p0), %s1697_s30, 0 }
  0x2f   : > { %201 = sbr.rel (%p1699_p0) target bundleno = 466 (0x1d2), region = 36 }
  0x36   : > { %1373 = dma.done.wait (%p1700_p2), [#allocation3], 4096  }
  0x37   : > { %1375 = vsyncadd (%p1700_p2), [#allocation3], 4294963200  ;;  %p232_p4 = scmp.lt.s32.totalorder %s1394_s18, 1  ;;  %v1407_v0 = vmov 2   ;;  %v1408_v1 = vmov 0   ;;  %v1409_v2 = vmov 0.0   ;;  %v243_v25 = vlaneseq }
  0x38   : > { %1248 = vset.pattern.permute.xlu1 %v1407_v0  ;;  %1247 = vset.pattern.permute.xlu0 %v1408_v1  ;;  %v1260_v5 = vld [vmem:[#allocation2] sm:$0xff]   ;;  %v1262_v7 = vld [vmem:[#allocation2 + $0x8] sm:$0xff]   ;;  %v1264_v9 = vld [vmem:[#allocation2 + $0x10] sm:$0xff]   ;;  %vm1410_vm0 = vmmov 0   ;;  %v1411_v11 = vmov 1   ;;  %v1412_v14 = vmov 3  }
  0x39   : > { %s233_s7 = scalar_select %p232_p4, %s1394_s18, 1  ;;  %1050 = vmatprep.subr.bf16.mxu1 %v1409_v2  ;;  %1090 = vmatprep.subr.bf16.mxu0 %v1409_v2  ;;  %v1261_v6 = vld [vmem:[#allocation2 + $0x80] sm:$0xff]   ;;  %v1263_v8 = vld [vmem:[#allocation2 + $0x88] sm:$0xff]   ;;  %v1265_v10 = vld [vmem:[#allocation2 + $0x90] sm:$0xff]   ;;  %v1583_v28 = vand.u32 127, %v243_v25 }
  0x3a   : > { %1051 = vmatpush3.bf16.msra.mxu1 %v1260_v5  ;;  %1091 = vmatpush3.bf16.msra.mxu0 %v1261_v6  ;;  %v1266_v12 = vld [vmem:[#allocation2 + $0x18] sm:$0xff]   ;;  %v1268_v15 = vld [vmem:[#allocation2 + $0x20] sm:$0xff]   ;;  %v1270_v17 = vld [vmem:[#allocation2 + $0x28] sm:$0xff]   ;;  %v1413_v33 = vmov 1.0|1.0   ;;  %s228_s21 = sand.u32 1, %s1386_s16  }
  0x3b   : > { %s1012_s29 = sshll.u32 %s233_s7, 4  ;;  %1052 = vmatprep.subr.bf16.mxu1 %v1409_v2  ;;  %1092 = vmatprep.subr.bf16.mxu0 %v1409_v2  ;;  %v1267_v13 = vld [vmem:[#allocation2 + $0x98] sm:$0xff]   ;;  %v1269_v16 = vld [vmem:[#allocation2 + $0xa0] sm:$0xff]   ;;  %v1271_v18 = vld [vmem:[#allocation2 + $0xa8] sm:$0xff]   ;;  %s951_s22 = sshll.u32 %s228_s21, 4 }
  0x3c   : > { %s239_s30 = scalar_lea.vmem %s1685_s0, %s1012_s29  ;;  %1066 = vmatprep.mubr.msk.bf16.mxu1 %vm1410_vm0, %v1409_v2  ;;  %1106 = vmatprep.mubr.msk.bf16.mxu0 %vm1410_vm0, %v1409_v2  ;;  %v1272_v19 = vld [vmem:[#allocation2 + $0x30] sm:$0xff]   ;;  %v1274_v21 = vld [vmem:[#allocation2 + $0x38] sm:$0xff]   ;;  %v1277_v31 = vld [vmem:[#allocation2 + $0xc0] sm:$0xff]   ;;  %s1013_s29 = sshll.u32 %s1394_s18, 8 }
  0x3d   : > { %v1544_v3 = vld [vmem:[%s239_s30] sm:$0xff]  ;;  %v1546_v4 = vld [vmem:[%s239_s30 + $0x8] sm:$0xff]  ;;  %v1273_v20 = vld [vmem:[#allocation2 + $0xb0] sm:$0xff]   ;;  %s230_s6 = scalar_lea.vmem [#allocation5], %s951_s22  ;;  %s1633_s10 = scalar_lea.hbm %s1689_s4, %s1013_s29 }
  0x3e   : > { %548 = vperm.xlu1 %1248, %v1544_v3   ;;  %257 = vperm.xlu0 %1247, %v1544_v3   ;;  %v1275_v22 = vld [vmem:[#allocation2 + $0xb8] sm:$0xff]   ;;  %vm577_vm1 = vcmp.eq.s32.totalorder %v1544_v3, 16  ;;  %vm286_vm2 = vcmp.eq.s32.totalorder %v1546_v4, 16  ;;  %v1276_v32 = vld [vmem:[#allocation2 + $0x40] sm:$0xff]   ;;  %v1279_v34 = vld [vmem:[#allocation2 + $0xc8] sm:$0xff]   ;;  %s853_s8 = sshll.u32 %s230_s6, 4  ;;  %s1635_s8 = int_to_ptr.vmem [resolvable:$true] %s853_s8 }
  0x3f   : > { %1053 = vmatpush3.bf16.msra.mxu1 %v1262_v7  ;;  %1093 = vmatpush3.bf16.msra.mxu0 %v1263_v8  ;;  %v288_v23 = vsel %vm577_vm1, 1, %v1408_v1  ;;  %v289_v24 = vsel %vm286_vm2, 1, %v1408_v1  ;;  %v1278_v35 = vld [vmem:[#allocation2 + $0x48] sm:$0xff]   ;;  %v1281_v36 = vld [vmem:[#allocation2 + $0xd0] sm:$0xff]   ;;  %v1283_v38 = vld [vmem:[#allocation2 + $0xd8] sm:$0xff]   ;;  %s1639_s18 = scalar_lea.sflag [#allocation4], %s228_s21 }
  0x40   : > { %1054 = vmatprep.subr.bf16.mxu1 %v1409_v2  ;;  %1094 = vmatprep.subr.bf16.mxu0 %v1409_v2  ;;  %v1280_v37 = vld [vmem:[#allocation2 + $0x50] sm:$0xff]   ;;  %v1282_v39 = vld [vmem:[#allocation2 + $0x58] sm:$0xff]   ;;  %v1285_v40 = vld [vmem:[#allocation2 + $0xe0] sm:$0xff]   ;;  %s1320_s11 = scalar_lea.vmem %s1635_s8, 256  ;;  %p1701_p10 = scmp.ne.s32.totalorder %s1694_s25, 0 }
  0x41   : > { %v1284_v41 = vld [vmem:[#allocation2 + $0x60] sm:$0xff]   ;;  %v1287_v42 = vld [vmem:[#allocation2 + $0xe8] sm:$0xff]   ;;  %v1288_v46 = vld [vmem:[#allocation2 + $0xf0] sm:$0xff]   ;;  %p1321_p8 = scmp.ne.s32.totalorder %s1635_s8, %s1320_s11  ;;  %s1414_s12 = smov [#allocation5]  }
  0x42   : > { %551 = vperm.xlu1 %1248, %v1546_v4   ;;  %260 = vperm.xlu0 %1247, %v1546_v4   ;;  %v1286_v45 = vld [vmem:[#allocation2 + $0x68] sm:$0xff]   ;;  %v1289_v47 = vld [vmem:[#allocation2 + $0x70] sm:$0xff]   ;;  %v1290_v50 = vld [vmem:[#allocation2 + $0xf8] sm:$0xff]   ;;  %s1324_s13 = sshll.u32 %s1414_s12, 4  ;;  %s1325_s13 = int_to_ptr.vmem [resolvable:$false] %s1324_s13 }
  0x43   : > { %1055 = vmatpush3.bf16.msra.mxu1 %v1264_v9  ;;  %1095 = vmatpush3.bf16.msra.mxu0 %v1265_v10  ;;  %v1291_v51 = vld [vmem:[#allocation2 + $0x78] sm:$0xff]   ;;  %v957_v56 = vld [vmem:[%s1687_s2] ss:$0 sm:$0xff]  ;;  %v970_v60 = vld [vmem:[%s1687_s2 + $0x1] ss:$0 sm:$0xff]  ;;  %p1322_p11 = pnand %p1321_p8, %p1701_p10  ;;  %s1326_s14 = scalar_lea.vmem %s1325_s13, 512 }
  0x44   : > { %1056 = vmatprep.subr.bf16.mxu1 %v1409_v2  ;;  %1096 = vmatprep.subr.bf16.mxu0 %v1409_v2  ;;  %v954_v58 = vld [vmem:[%s1688_s3] ss:$0 sm:$0xff]  ;;  %v983_v6 = vld [vmem:[%s1687_s2 + $0x2] ss:$0 sm:$0xff]  ;;  %p1327_p1 = scmp.lt.s32.totalorder %s1635_s8, %s1325_s13  ;;  %p1328_p3 = scmp.lt.s32.totalorder %s1326_s14, %s1320_s11 }
  0x45   : > { %p1323_p13 = pneg %p1322_p11 }
  0x46   : > { %1250 = vset.pattern.permute.xlu1 %v1411_v11  ;;  %1249 = vset.pattern.permute.xlu0 %v1411_v11  ;;  %p1329_p5 = por %p1328_p3, %p1327_p1 }
  0x47   : > { %405 = vperm.xlu1 %1250, %v1546_v4   ;;  %402 = vperm.xlu0 %1249, %v1544_v3  }
  0x48   : > { %1057 = vmatpush3.bf16.msra.mxu1 %v1266_v12  ;;  %1097 = vmatpush3.bf16.msra.mxu0 %v1267_v13  ;;  %p1330_p6 = pnand %p1329_p5, %p1323_p13 }
  0x49   : > { %1058 = vmatprep.subr.bf16.mxu1 %v1409_v2  ;;  %1098 = vmatprep.subr.bf16.mxu0 %v1409_v2 }
  0x4b   : > { %1251 = vset.pattern.permute.xlu1 %v1412_v14  ;;  %1252 = vset.pattern.permute.xlu0 %v1412_v14 }
  0x4c   : > { %694 = vperm.xlu1 %1251, %v1544_v3   ;;  %697 = vperm.xlu0 %1252, %v1546_v4  }
  0x4d   : > { %1059 = vmatpush3.bf16.msra.mxu1 %v1268_v15  ;;  %1099 = vmatpush3.bf16.msra.mxu0 %v1269_v16 }
  0x4e   : > { %1060 = vmatprep.subr.bf16.mxu1 %v1409_v2  ;;  %1100 = vmatprep.subr.bf16.mxu0 %v1409_v2 }
  0x50   : > { %1253 = vset.pattern.permute.xlu1 %v1408_v1  ;;  %1254 = vset.pattern.permute.xlu0 %v1411_v11 }
  0x51   : > { %1061 = vmatpush3.bf16.msra.mxu1 %v1270_v17  ;;  %1101 = vmatpush3.bf16.msra.mxu0 %v1271_v18 }
  0x52   : > { %1062 = vmatprep.subr.bf16.mxu1 %v1409_v2  ;;  %1102 = vmatprep.subr.bf16.mxu0 %v1409_v2 }
  0x53   : > { %291 = vperm.xlu1 %1253, %v288_v23   ;;  %437 = vperm.xlu0 %1254, %v288_v23  }
  0x55   : > { %1063 = vmatpush3.bf16.msra.mxu1 %v1272_v19  ;;  %1103 = vmatpush3.bf16.msra.mxu0 %v1273_v20 }
  0x56   : > { %1064 = vmatprep.subr.bf16.mxu1 %v1409_v2  ;;  %1104 = vmatprep.subr.bf16.mxu0 %v1409_v2 }
  0x57   : > { %294 = vperm.xlu1 %1253, %v289_v24   ;;  %1257 = vset.pattern.permute.xlu0 %v1407_v0 }
  0x58   : > { %586 = vperm.xlu0 %1257, %v289_v24  }
  0x59   : > { %1065 = vmatpush3.bf16.msra.mxu1 %v1274_v21  ;;  %1105 = vmatpush3.bf16.msra.mxu0 %v1275_v22 }
  0x5a   : > { %1070 = vmatprep.subr.bf16.mxu1 %v1409_v2  ;;  %1110 = vmatprep.subr.bf16.mxu0 %v1409_v2 }
  0x5b   : > { %1255 = vset.pattern.permute.xlu1 %v1411_v11 }
  0x5c   : > { %440 = vperm.xlu1 %1255, %v289_v24   ;;  %1259 = vset.pattern.permute.xlu0 %v1412_v14 }
  0x60   : > { %1256 = vset.pattern.permute.xlu1 %v1407_v0 }
  0x61   : > { %583 = vperm.xlu1 %1256, %v288_v23  }
  0x65   : > { %1258 = vset.pattern.permute.xlu1 %v1412_v14  ;;  %v996_v14 = vld [vmem:[%s1687_s2 + $0x3] ss:$0 sm:$0xff] }
  0x66   : > { %729 = vperm.xlu1 %1258, %v288_v23  }
  0x6a   : > { %732 = vperm.xlu1 %1258, %v289_v24  }
  0xbd   : > { %v549_v26 = vpop.permute.xlu1 %548  ;;  %v258_v27 = vpop.permute.xlu0 %257 }
  0xbe   : > { %vm553_vm3 = vcmp.eq.s32.totalorder %v549_v26, %v1583_v28  ;;  %vm262_vm6 = vcmp.eq.s32.totalorder %v258_v27, %v1583_v28 }
  0xc1   : > { %v552_v29 = vpop.permute.xlu1 %551  ;;  %v261_v30 = vpop.permute.xlu0 %260 }
  0xc2   : > { %vm554_vm4 = vcmp.eq.s32.totalorder %v552_v29, %v1583_v28  ;;  %vm263_vm5 = vcmp.eq.s32.totalorder %v261_v30, %v1583_v28 }
  0xc3   : > { %vm992_vm7 = vmpackc.low %vm554_vm4, %vm553_vm3 }
  0xc4   : > { %vm966_vm8 = vmpackc.low %vm263_vm5, %vm262_vm6  ;;  %1107 = vmatmul.mubr.msk.bf16.vlgmr.msra.gmra.mrb[0].mxu0 %vm992_vm7, %v1413_v33 }
  0xc5   : > { %1067 = vmatmul.mubr.msk.bf16.vlgmr.msra.gmra.mrb[0].mxu1 %vm966_vm8, %v1413_v33  ;;  %1111 = vmatpush3.bf16.msra.mxu0 %v1277_v31 }
  0xc6   : > { %1071 = vmatpush3.bf16.msra.mxu1 %v1276_v32  ;;  %1112 = vmatprep.subr.bf16.mxu0 %v1409_v2  ;;  %v406_v43 = vpop.permute.xlu1 %405  ;;  %v403_v44 = vpop.permute.xlu0 %402 }
  0xc7   : > { %1072 = vmatprep.subr.bf16.mxu1 %v1409_v2  ;;  %1086 = vmatprep.mubr.msk.bf16.mxu1 %vm1410_vm0, %v1409_v2  ;;  %vm408_vm11 = vcmp.eq.s32.totalorder %v406_v43, %v1583_v28  ;;  %vm407_vm12 = vcmp.eq.s32.totalorder %v403_v44, %v1583_v28 }
  0xc8   : > { %1126 = vmatprep.mubr.msk.bf16.mxu0 %vm1410_vm0, %v1409_v2  ;;  %vm979_vm14 = vmpackc.low %vm408_vm11, %vm407_vm12 }
  0xc9   : > { %1113 = vmatpush3.bf16.msra.mxu0 %v1279_v34 }
  0xca   : > { %1073 = vmatpush3.bf16.msra.mxu1 %v1278_v35  ;;  %1114 = vmatprep.subr.bf16.mxu0 %v1409_v2 }
  0xcb   : > { %1074 = vmatprep.subr.bf16.mxu1 %v1409_v2  ;;  %v695_v48 = vpop.permute.xlu1 %694  ;;  %v698_v49 = vpop.permute.xlu0 %697 }
  0xcc   : > { %vm699_vm9 = vcmp.eq.s32.totalorder %v695_v48, %v1583_v28  ;;  %vm700_vm10 = vcmp.eq.s32.totalorder %v698_v49, %v1583_v28 }
  0xcd   : > { %1115 = vmatpush3.bf16.msra.mxu0 %v1281_v36  ;;  %vm1005_vm13 = vmpackc.low %vm700_vm10, %vm699_vm9 }
  0xce   : > { %1075 = vmatpush3.bf16.msra.mxu1 %v1280_v37  ;;  %1116 = vmatprep.subr.bf16.mxu0 %v1409_v2 }
  0xcf   : > { %1076 = vmatprep.subr.bf16.mxu1 %v1409_v2 }
  0xd1   : > { %1117 = vmatpush3.bf16.msra.mxu0 %v1283_v38 }
  0xd2   : > { %1077 = vmatpush3.bf16.msra.mxu1 %v1282_v39  ;;  %1118 = vmatprep.subr.bf16.mxu0 %v1409_v2  ;;  %v292_v52 = vpop.permute.xlu1 %291  ;;  %v438_v57 = vpop.permute.xlu0 %437 }
  0xd3   : > { %1078 = vmatprep.subr.bf16.mxu1 %v1409_v2  ;;  %vm296_vm15 = vcmp.eq.s32.totalorder %v292_v52, 1  ;;  %vm442_vm1 = vcmp.eq.s32.totalorder %v438_v57, 1 }
  0xd4   : > { %v302_v59 = vsel %vm296_vm15, %v957_v56, 0.0  ;;  %v448_v0 = vsel %vm442_vm1, %v970_v60, 0.0 }
  0xd5   : > { %1119 = vmatpush3.bf16.msra.mxu0 %v1285_v40  ;;  %v1130_v63 = vadd.f32 %v954_v58, %v302_v59 }
  0xd6   : > { %1079 = vmatpush3.bf16.msra.mxu1 %v1284_v41  ;;  %1120 = vmatprep.subr.bf16.mxu0 %v1409_v2  ;;  %v295_v53 = vpop.permute.xlu1 %294 }
  0xd7   : > { %1080 = vmatprep.subr.bf16.mxu1 %v1409_v2  ;;  %vm297_vm0 = vcmp.eq.s32.totalorder %v295_v53, 1  ;;  %v587_v1 = vpop.permute.xlu0 %586  ;;  %v1133_v4 = vadd.f32 %v1130_v63, %v448_v0 }
  0xd8   : > { %v303_v62 = vsel %vm297_vm0, %v957_v56, 0.0  ;;  %vm589_vm4 = vcmp.eq.s32.totalorder %v587_v1, 1 }
  0xd9   : > { %1121 = vmatpush3.bf16.msra.mxu0 %v1287_v42  ;;  %v595_v18 = vsel %vm589_vm4, %v983_v6, 0.0 }
  0xda   : > { %1081 = vmatpush3.bf16.msra.mxu1 %v1286_v45  ;;  %1122 = vmatprep.subr.bf16.mxu0 %v1409_v2 }
  0xdb   : > { %1082 = vmatprep.subr.bf16.mxu1 %v1409_v2  ;;  %v441_v54 = vpop.permute.xlu1 %440 }
  0xdc   : > { %vm443_vm2 = vcmp.eq.s32.totalorder %v441_v54, 1 }
  0xdd   : > { %1123 = vmatpush3.bf16.msra.mxu0 %v1288_v46  ;;  %v449_v3 = vsel %vm443_vm2, %v970_v60, 0.0 }
  0xde   : > { %1083 = vmatpush3.bf16.msra.mxu1 %v1289_v47  ;;  %1124 = vmatprep.subr.bf16.mxu0 %v1409_v2 }
  0xdf   : > { %1084 = vmatprep.subr.bf16.mxu1 %v1409_v2  ;;  %v1146_v2 = vadd.f32 %v954_v58, %v303_v62 }
  0xe0   : > { %v584_v55 = vpop.permute.xlu1 %583 }
  0xe1   : > { %1125 = vmatpush3.bf16.msra.mxu0 %v1290_v50  ;;  %vm588_vm3 = vcmp.eq.s32.totalorder %v584_v55, 1  ;;  %v1149_v10 = vadd.f32 %v1146_v2, %v449_v3 }
  0xe2   : > { %1085 = vmatpush3.bf16.msra.mxu1 %v1291_v51  ;;  %v594_v17 = vsel %vm588_vm3, %v983_v6, 0.0 }
  0xe4   : > { %1127 = vmatmul.mubr.msk.bf16.vlgmr.msra.gmra.mrb[0].mxu0 %vm1005_vm13, %v1413_v33 }
  0xe5   : > { %1087 = vmatmul.mubr.msk.bf16.vlgmr.msra.gmra.mrb[0].mxu1 %vm979_vm14, %v1413_v33  ;;  %v730_v61 = vpop.permute.xlu1 %729 }
  0xe6   : > { %vm734_vm5 = vcmp.eq.s32.totalorder %v730_v61, 1 }
  0xe7   : > { %v740_v22 = vsel %vm734_vm5, %v996_v14, 0.0 }
  0xe9   : > { %v733_v7 = vpop.permute.xlu1 %732 }
  0xea   : > { %vm735_vm6 = vcmp.eq.s32.totalorder %v733_v7, 1 }
  0xeb   : > { %v741_v25 = vsel %vm735_vm6, %v996_v14, 0.0 }
 0x1b7   : > { %v824_v5 = vpop.f32.mrb[0].mxu0 }
 0x1b8   : > { %v532_v8 = vpop.f32.mrb[0].mxu1  ;;  %v1128_v9 = vpop.f32.mrb[1].mxu0 }
 0x1b9   : > { %v1136_v11 = vadd.f32 %v1133_v4, %v532_v8  ;;  %v1088_v12 = vpop.f32.mrb[1].mxu1  ;;  %v827_v13 = vpop.f32.mrb[2].mxu0 }
 0x1ba   : > { %v535_v15 = vpop.f32.mrb[2].mxu1  ;;  %v1129_v16 = vpop.f32.mrb[3].mxu0 }
 0x1bb   : > { %v1152_v19 = vadd.f32 %v1149_v10, %v535_v15  ;;  %v1089_v20 = vpop.f32.mrb[3].mxu1  ;;  %v1139_v21 = vadd.f32 %v1136_v11, %v594_v17 }
 0x1bd   : > { %v1155_v23 = vadd.f32 %v1152_v19, %v595_v18  ;;  %v1142_v24 = vadd.f32 %v1139_v21, %v740_v22 }
 0x1bf   : > { %v1158_v26 = vadd.f32 %v1155_v23, %v741_v25  ;;  %v1145_v27 = vadd.f32 %v1142_v24, %v824_v5 }
 0x1c1   : > { %v1161_v28 = vadd.f32 %v1158_v26, %v827_v13  ;;  %835 = vst [vmem:[%s230_s6] sm:$0xff] %v1145_v27 }
 0x1c3   : > { %836 = vst [vmem:[%s230_s6 + $0x8] sm:$0xff] %v1161_v28 }
 0x1c4   : > { %1333 = shalt.err (!%p1330_p6)
}
 0x1c5   : > { %s1334_s21 = scalar_lea.hbm %s1633_s10, 256  ;;  %s1338_s26 = scalar_lea.hbm %s1689_s4, 512 }
 0x1c6   : > { %p1335_p7 = scmp.ne.s32.totalorder %s1633_s10, %s1334_s21  ;;  %p1339_p0 = scmp.lt.u32.totalorder %s1633_s10, %s1689_s4 }
 0x1c7   : > { %p1340_p2 = scmp.lt.u32.totalorder %s1338_s26, %s1334_s21  ;;  %p1342_p8 = scmp.lt.u32.totalorder %s1334_s21, %s1633_s10 }
 0x1c8   : > { %p1336_p9 = pnand %p1335_p7, %p1701_p10 }
 0x1c9   : > { %p1341_p4 = por %p1340_p2, %p1339_p0 }
 0x1ca   : > { %p1337_p12 = pneg %p1336_p9 }
 0x1cb   : > { %p1343_p11 = por %p1342_p8, %p1341_p4 }
 0x1cd   : > { %p1344_p13 = pnand %p1343_p11, %p1337_p12 }
 0x1cf   : > { %1347 = shalt.err (!%p1344_p13)
}
 0x1d0   : > { %s1415_s29 = smov 128   ;;  %s1416_s6 = smov 8  }
 0x1d1   : > { %1174 = dma.vmem_to_hbm [thread:$0]  (%p1701_p10), %s1635_s8, 256, %s1633_s10, %s1639_s18, %s1415_s29, %s1415_s29, %s1416_s6  }
 0x1d2 PF: > { %p1186_p1 = scmp.ge.s32.totalorder %s1402_s20, 2  ;;  %s868_s30 = sand.u32 1, %s1382_s15  }
 0x1d3   : > { %p1702_p3 = scmp.ne.s32.totalorder %s1695_s27, 0  ;;  %s869_s9 = scalar_lea.sflag [#allocation4], %s868_s30 }
 0x1d5   : > { %p1181_p5 = pnand %p1186_p1, %p1702_p3 }
 0x1d7   : > { %1377 = dma.done.wait (!%p1181_p5), %s869_s9, 256  }
 0x1d8   : > { %1379 = vsyncadd (!%p1181_p5), %s869_s9, 4294967040  ;;  %s18_s20 = sadd.s32 1, %s1402_s20   ;;  %s1703_s15 = smov %s1386_s16 }
 0x1d9   : > { %p15_p6 = scmp.ge.s32.totalorder %s18_s20, 4   ;;  %s1704_s16 = smov %s1390_s17 }
 0x1da   : > { %s1705_s17 = smov %s1495_s28  ;;  %s1706_s18 = smov %s1398_s19 }
 0x1db   : > { %s1707_s19 = smov %s1709_s23  ;;  %17 = sbr.rel (!%p15_p6) target bundleno = 5 (0x5), region = 79 }
 0x1e2   :  { %874 = vsyncpa [#allocation3], 1 }
 0x1e3   :  { %876 = vsyncpa [#allocation3 + $0x1], 1 }
 0x1e4   :  { %877 = vsyncpa [#allocation4], 1 }
 0x1e5   :  { %879 = vsyncpa [#allocation4 + $0x1], 1 }

</bundles_post_ra>
